<compile_context>
chip_gen: v5e
topology: v5e:2x2
jax: 0.10.0
libtpu: 0.0.40
codegen_flags: <defaults>
</compile_context>

<pallas_src>
import functools
import math

import jax
import jax.numpy as jnp
from jax.experimental import pallas as pl
from jax.experimental.pallas import tpu as pltpu


def _double_conv_kernel(x_ref, w1_ref, b1_ref, w2_ref, b2_ref, mask_ref,
                        o_ref, col1_ref, col2_ref, *, W):
    # x_ref    : (C_in_p,  TL)          channel-major, spatial(+batch) on lanes
    # w1_ref   : (C_mid_p, 9*C_in_p)    bf16, BN1 scale folded in
    # b1_ref   : (C_mid_p, 1)           f32 BN1 bias
    # w2_ref   : (C_out_p, 9*C_mid_p)   bf16, BN2 scale folded in
    # b2_ref   : (C_out_p, 1)           f32 BN2 bias
    # mask_ref : (9, 1, TL)             f32 per-tap border validity mask
    # o_ref    : (C_out_p, TL)
    # col*_ref : bf16 im2col scratch, taps stacked along the contraction axis
    L = x_ref.shape[1]

    def im2col(src_f32, col_ref):
        C = src_f32.shape[0]
        for t in range(9):
            dy, dx = t // 3 - 1, t % 3 - 1
            off = dy * W + dx
            if off == 0:
                tap = src_f32                         # centre tap: no mask needed
            else:
                tap = pltpu.roll(src_f32, (-off) % L, axis=1) * mask_ref[t]
            col_ref[pl.ds(t * C, C), :] = tap.astype(jnp.bfloat16)

    x = x_ref[...].astype(jnp.float32)
    im2col(x, col1_ref)
    h = jnp.dot(w1_ref[...], col1_ref[...], preferred_element_type=jnp.float32)
    mid = jnp.maximum(h + b1_ref[...], 0.0)           # BN bias + ReLU (f32)
    im2col(mid, col2_ref)
    out = jnp.dot(w2_ref[...], col2_ref[...], preferred_element_type=jnp.float32)
    out = jnp.maximum(out + b2_ref[...], 0.0)
    o_ref[...] = out.astype(o_ref.dtype)


def _round_up(x, m):
    return (x + m - 1) // m * m


def _pick_images_per_step(N, HW_pad):
    """Whole images per grid step: target >=2048 lanes/step to amortise the
    ~0.35us step overhead, but keep >=2 steps when N >= 2 (v7x megacore)."""
    g = max(1, 2048 // HW_pad)
    if N >= 2:
        g = min(g, N // 2)
    g = max(1, min(g, N))
    while N % g:
        g -= 1
    return g


def double_conv_pallas(x, w1, bn1, w2, bn2, *, eps=1e-5):
    """DoubleConv.forward (inference BN) as a single fused Pallas kernel.

    x  : (N, C_in, H, W)
    w1 : (C_mid, C_in, 3, 3)   bn1 = (gamma, beta, running_mean, running_var)
    w2 : (C_out, C_mid, 3, 3)  bn2 = (gamma, beta, running_mean, running_var)
    returns (N, C_out, H, W)
    """
    N, C_in, H, W = x.shape
    C_mid = w1.shape[0]
    C_out = w2.shape[0]
    HW = H * W

    # Padding: channels -> multiple of 16 (bf16 sublane packing), spatial plane
    # -> multiple of 128 lanes (unmasked, lane-dense loads/stores).
    C_in_p, C_mid_p, C_out_p = (_round_up(c, 16) for c in (C_in, C_mid, C_out))
    HW_p = _round_up(HW, 128)
    g = _pick_images_per_step(N, HW_p)
    TL = g * HW_p                         # lane extent per grid step
    L = N * HW_p                          # total lane extent
    grid = (N // g,)

    f32 = jnp.float32
    g1, be1, m1, v1 = bn1
    g2, be2, m2, v2 = bn2
    s1 = g1.astype(f32) / jnp.sqrt(v1.astype(f32) + eps)
    s2 = g2.astype(f32) / jnp.sqrt(v2.astype(f32) + eps)
    b1 = jnp.pad(be1.astype(f32) - m1.astype(f32) * s1,
                 (0, C_mid_p - C_mid)).reshape(C_mid_p, 1)
    b2 = jnp.pad(be2.astype(f32) - m2.astype(f32) * s2,
                 (0, C_out_p - C_out)).reshape(C_out_p, 1)

    # Fold BN scale into conv weights; layout (C_out, 9*C_in) = tap-major /
    # channel-minor, matching the in-kernel im2col stacking.
    def fold(w, s, co_p, ci_p):
        co, ci = w.shape[0], w.shape[1]
        wf = w.astype(f32) * s[:, None, None, None]
        wf = jnp.pad(wf, ((0, co_p - co), (0, ci_p - ci), (0, 0), (0, 0)))
        wf = jnp.transpose(wf, (0, 2, 3, 1)).reshape(co_p, 9 * ci_p)
        return wf.astype(jnp.bfloat16)

    w1f = fold(w1, s1, C_mid_p, C_in_p)
    w2f = fold(w2, s2, C_out_p, C_mid_p)

    # Per-tap border-validity mask over one padded image plane, tiled to the
    # per-step lane extent (identical for every image and every grid step;
    # padding lanes are masked out for all non-centre taps).
    row = jnp.arange(H).reshape(H, 1)
    col = jnp.arange(W).reshape(1, W)
    taps = []
    for t in range(9):
        dy, dx = t // 3 - 1, t % 3 - 1
        ok = ((row + dy >= 0) & (row + dy < H) &
              (col + dx >= 0) & (col + dx < W)).reshape(HW)
        taps.append(jnp.pad(ok, (0, HW_p - HW)))
    mask = jnp.stack(taps).astype(f32).reshape(9, 1, HW_p)
    mask = jnp.tile(mask, (1, 1, g))                       # (9, 1, TL)

    # Channel-major, lane-dense activation layout: (C_in_p, N*HW_p).
    x_flat = jnp.pad(x.reshape(N, C_in, HW),
                     ((0, 0), (0, C_in_p - C_in), (0, HW_p - HW)))
    x_packed = jnp.transpose(x_flat, (1, 0, 2)).reshape(C_in_p, L)

    flops = 2 * L * 9 * (C_in_p * C_mid_p + C_mid_p * C_out_p)
    bytes_accessed = (4 * L * (C_in_p + C_out_p)
                      + 2 * (w1f.size + w2f.size)
                      + 4 * (b1.size + b2.size + mask.size))

    out_packed = pl.pallas_call(
        functools.partial(_double_conv_kernel, W=W),
        out_shape=jax.ShapeDtypeStruct((C_out_p, L), x.dtype),
        grid=grid,
        in_specs=[
            pl.BlockSpec((C_in_p, TL), lambda i: (0, i)),
            pl.BlockSpec((C_mid_p, 9 * C_in_p), lambda i: (0, 0)),
            pl.BlockSpec((C_mid_p, 1), lambda i: (0, 0)),
            pl.BlockSpec((C_out_p, 9 * C_mid_p), lambda i: (0, 0)),
            pl.BlockSpec((C_out_p, 1), lambda i: (0, 0)),
            pl.BlockSpec((9, 1, TL), lambda i: (0, 0, 0)),
        ],
        out_specs=pl.BlockSpec((C_out_p, TL), lambda i: (0, i)),
        scratch_shapes=[
            pltpu.VMEM((9 * C_in_p, TL), jnp.bfloat16),    # im2col stage 1
            pltpu.VMEM((9 * C_mid_p, TL), jnp.bfloat16),   # im2col stage 2
        ],
        compiler_params=pltpu.CompilerParams(
            dimension_semantics=("parallel",),
            vmem_limit_bytes=64 * 1024 * 1024,
        ),
        cost_estimate=pl.CostEstimate(flops=flops, transcendentals=0,
                                      bytes_accessed=bytes_accessed),
    )(x_packed, w1f, b1, w2f, b2, mask)

    out = out_packed.reshape(C_out_p, N, HW_p)
    out = jnp.transpose(out, (1, 0, 2))[:, :C_out, :HW]
    return out.reshape(N, C_out, H, W)


def _double_conv_reference(x, w1, bn1, w2, bn2, eps=1e-5):
    """Pure-JAX reference: conv3x3 -> BN(eval) -> ReLU, twice (f32)."""
    def conv(a, w):
        return jax.lax.conv_general_dilated(
            a, w, window_strides=(1, 1), padding=((1, 1), (1, 1)),
            dimension_numbers=("NCHW", "OIHW", "NCHW"))

    def bn(a, params):
        g, b, m, v = params
        g = g.reshape(1, -1, 1, 1); b = b.reshape(1, -1, 1, 1)
        m = m.reshape(1, -1, 1, 1); v = v.reshape(1, -1, 1, 1)
        return (a - m) / jnp.sqrt(v + eps) * g + b

    h = jax.nn.relu(bn(conv(x, w1), bn1))
    return jax.nn.relu(bn(conv(h, w2), bn2))


if __name__ == "__main__":
    key = jax.random.PRNGKey(0)
    ks = jax.random.split(key, 11)

    N, C_in, H, W = 2, 4, 16, 16
    C_out = 8
    C_mid = C_out  # mid_channels defaults to out_channels

    x = jax.random.normal(ks[0], (N, C_in, H, W), dtype=jnp.float32)

    bound1 = 1.0 / math.sqrt(C_in * 9)
    w1 = jax.random.uniform(ks[1], (C_mid, C_in, 3, 3), jnp.float32,
                            -bound1, bound1)
    bound2 = 1.0 / math.sqrt(C_mid * 9)
    w2 = jax.random.uniform(ks[2], (C_out, C_mid, 3, 3), jnp.float32,
                            -bound2, bound2)

    g1 = jax.random.uniform(ks[3], (C_mid,), jnp.float32, 0.5, 1.5)
    be1 = 0.1 * jax.random.normal(ks[4], (C_mid,), dtype=jnp.float32)
    m1 = 0.1 * jax.random.normal(ks[5], (C_mid,), dtype=jnp.float32)
    v1 = jax.random.uniform(ks[6], (C_mid,), jnp.float32, 0.5, 1.5)

    g2 = jax.random.uniform(ks[7], (C_out,), jnp.float32, 0.5, 1.5)
    be2 = 0.1 * jax.random.normal(ks[8], (C_out,), dtype=jnp.float32)
    m2 = 0.1 * jax.random.normal(ks[9], (C_out,), dtype=jnp.float32)
    v2 = jax.random.uniform(ks[10], (C_out,), jnp.float32, 0.5, 1.5)

    bn1 = (g1, be1, m1, v1)
    bn2 = (g2, be2, m2, v2)

    out = double_conv_pallas(x, w1, bn1, w2, bn2)
    out = jax.block_until_ready(out)

    ref = _double_conv_reference(x, w1, bn1, w2, bn2)
    assert out.shape == (N, C_out, H, W)
    # bf16 MXU operands (f32 accumulation) -> loosened tolerance vs f32 ref.
    err = float(jnp.max(jnp.abs(out - ref)))
    assert jnp.allclose(out, ref, atol=5e-2, rtol=5e-2), err

    print("KERNEL_OK")
</pallas_src>

<mosaic_0001>
module attributes {stable_mosaic.version = 11 : i64} {
  func.func @_double_conv_kernel(%arg0: i32, %arg1: memref<16x256xf32, #tpu.memory_space<vmem>>, %arg2: memref<16x144xbf16, #tpu.memory_space<vmem>>, %arg3: memref<16x1xf32, #tpu.memory_space<vmem>>, %arg4: memref<16x144xbf16, #tpu.memory_space<vmem>>, %arg5: memref<16x1xf32, #tpu.memory_space<vmem>>, %arg6: memref<9x1x256xf32, #tpu.memory_space<vmem>>, %arg7: memref<16x256xf32, #tpu.memory_space<vmem>>, %arg8: memref<144x256xbf16, #tpu.memory_space<vmem>>, %arg9: memref<144x256xbf16, #tpu.memory_space<vmem>>) attributes {dimension_semantics = [#tpu.dimension_semantics<parallel>], iteration_bounds = array<i64: 2>, scalar_prefetch = 0 : i64, scratch_operands = 2 : i64, tpu.core_type = #tpu.core_type<tc>, window_params = [{transform_indices = @transform_0, window_bounds = array<i64: 16, 256>}, {pipeline_mode = #tpu.pipeline_mode<synchronous>, transform_indices = @transform_1, window_bounds = array<i64: 16, 144>}, {pipeline_mode = #tpu.pipeline_mode<synchronous>, transform_indices = @transform_2, window_bounds = array<i64: 16, 1>}, {pipeline_mode = #tpu.pipeline_mode<synchronous>, transform_indices = @transform_3, window_bounds = array<i64: 16, 144>}, {pipeline_mode = #tpu.pipeline_mode<synchronous>, transform_indices = @transform_4, window_bounds = array<i64: 16, 1>}, {pipeline_mode = #tpu.pipeline_mode<synchronous>, transform_indices = @transform_5, window_bounds = array<i64: 9, 1, 256>}, {transform_indices = @transform_6, window_bounds = array<i64: 16, 256>}]} {
    %c0 = arith.constant 0 : index
    %c0_0 = arith.constant 0 : index
    %0 = vector.load %arg1[%c0, %c0_0] : memref<16x256xf32, #tpu.memory_space<vmem>>, vector<16x256xf32>
    %c17_i32 = arith.constant 17 : i32
    %1 = tpu.dynamic_rotate %0 by %c17_i32 dim 1 : vector<16x256xf32>, i32 -> vector<16x256xf32>
    %c0_1 = arith.constant 0 : index
    %c0_2 = arith.constant 0 : index
    %c0_3 = arith.constant 0 : index
    %2 = vector.load %arg6[%c0_1, %c0_2, %c0_3] : memref<9x1x256xf32, #tpu.memory_space<vmem>>, vector<1x1x256xf32>
    %3 = vector.shape_cast %2 : vector<1x1x256xf32> to vector<1x256xf32>
    %4 = vector.broadcast %3 : vector<1x256xf32> to vector<16x256xf32>
    %5 = arith.mulf %1, %4 : vector<16x256xf32>
    %6 = arith.truncf %5 : vector<16x256xf32> to vector<16x256xbf16>
    %c0_4 = arith.constant 0 : index
    %c0_5 = arith.constant 0 : index
    %7 = vector.load %arg8[%c0_4, %c0_5] : memref<144x256xbf16, #tpu.memory_space<vmem>>, vector<16x256xbf16>
    tpu.vector_store %arg8[%c0_4, %c0_5], %6 {strides = array<i32>} : memref<144x256xbf16, #tpu.memory_space<vmem>>, vector<16x256xbf16>,
    %c16_i32 = arith.constant 16 : i32
    %8 = tpu.dynamic_rotate %0 by %c16_i32 dim 1 : vector<16x256xf32>, i32 -> vector<16x256xf32>
    %c1 = arith.constant 1 : index
    %c0_6 = arith.constant 0 : index
    %c0_7 = arith.constant 0 : index
    %9 = vector.load %arg6[%c1, %c0_6, %c0_7] : memref<9x1x256xf32, #tpu.memory_space<vmem>>, vector<1x1x256xf32>
    %10 = vector.shape_cast %9 : vector<1x1x256xf32> to vector<1x256xf32>
    %11 = vector.broadcast %10 : vector<1x256xf32> to vector<16x256xf32>
    %12 = arith.mulf %8, %11 : vector<16x256xf32>
    %13 = arith.truncf %12 : vector<16x256xf32> to vector<16x256xbf16>
    %c16 = arith.constant 16 : index
    %c0_8 = arith.constant 0 : index
    %14 = vector.load %arg8[%c16, %c0_8] : memref<144x256xbf16, #tpu.memory_space<vmem>>, vector<16x256xbf16>
    tpu.vector_store %arg8[%c16, %c0_8], %13 {strides = array<i32>} : memref<144x256xbf16, #tpu.memory_space<vmem>>, vector<16x256xbf16>,
    %c15_i32 = arith.constant 15 : i32
    %15 = tpu.dynamic_rotate %0 by %c15_i32 dim 1 : vector<16x256xf32>, i32 -> vector<16x256xf32>
    %c2 = arith.constant 2 : index
    %c0_9 = arith.constant 0 : index
    %c0_10 = arith.constant 0 : index
    %16 = vector.load %arg6[%c2, %c0_9, %c0_10] : memref<9x1x256xf32, #tpu.memory_space<vmem>>, vector<1x1x256xf32>
    %17 = vector.shape_cast %16 : vector<1x1x256xf32> to vector<1x256xf32>
    %18 = vector.broadcast %17 : vector<1x256xf32> to vector<16x256xf32>
    %19 = arith.mulf %15, %18 : vector<16x256xf32>
    %20 = arith.truncf %19 : vector<16x256xf32> to vector<16x256xbf16>
    %c32 = arith.constant 32 : index
    %c0_11 = arith.constant 0 : index
    %21 = vector.load %arg8[%c32, %c0_11] : memref<144x256xbf16, #tpu.memory_space<vmem>>, vector<16x256xbf16>
    tpu.vector_store %arg8[%c32, %c0_11], %20 {strides = array<i32>} : memref<144x256xbf16, #tpu.memory_space<vmem>>, vector<16x256xbf16>,
    %c1_i32 = arith.constant 1 : i32
    %22 = tpu.dynamic_rotate %0 by %c1_i32 dim 1 : vector<16x256xf32>, i32 -> vector<16x256xf32>
    %c3 = arith.constant 3 : index
    %c0_12 = arith.constant 0 : index
    %c0_13 = arith.constant 0 : index
    %23 = vector.load %arg6[%c3, %c0_12, %c0_13] : memref<9x1x256xf32, #tpu.memory_space<vmem>>, vector<1x1x256xf32>
    %24 = vector.shape_cast %23 : vector<1x1x256xf32> to vector<1x256xf32>
    %25 = vector.broadcast %24 : vector<1x256xf32> to vector<16x256xf32>
    %26 = arith.mulf %22, %25 : vector<16x256xf32>
    %27 = arith.truncf %26 : vector<16x256xf32> to vector<16x256xbf16>
    %c48 = arith.constant 48 : index
    %c0_14 = arith.constant 0 : index
    %28 = vector.load %arg8[%c48, %c0_14] : memref<144x256xbf16, #tpu.memory_space<vmem>>, vector<16x256xbf16>
    tpu.vector_store %arg8[%c48, %c0_14], %27 {strides = array<i32>} : memref<144x256xbf16, #tpu.memory_space<vmem>>, vector<16x256xbf16>,
    %29 = arith.truncf %0 : vector<16x256xf32> to vector<16x256xbf16>
    %c64 = arith.constant 64 : index
    %c0_15 = arith.constant 0 : index
    %30 = vector.load %arg8[%c64, %c0_15] : memref<144x256xbf16, #tpu.memory_space<vmem>>, vector<16x256xbf16>
    tpu.vector_store %arg8[%c64, %c0_15], %29 {strides = array<i32>} : memref<144x256xbf16, #tpu.memory_space<vmem>>, vector<16x256xbf16>,
    %c255_i32 = arith.constant 255 : i32
    %31 = tpu.dynamic_rotate %0 by %c255_i32 dim 1 : vector<16x256xf32>, i32 -> vector<16x256xf32>
    %c5 = arith.constant 5 : index
    %c0_16 = arith.constant 0 : index
    %c0_17 = arith.constant 0 : index
    %32 = vector.load %arg6[%c5, %c0_16, %c0_17] : memref<9x1x256xf32, #tpu.memory_space<vmem>>, vector<1x1x256xf32>
    %33 = vector.shape_cast %32 : vector<1x1x256xf32> to vector<1x256xf32>
    %34 = vector.broadcast %33 : vector<1x256xf32> to vector<16x256xf32>
    %35 = arith.mulf %31, %34 : vector<16x256xf32>
    %36 = arith.truncf %35 : vector<16x256xf32> to vector<16x256xbf16>
    %c80 = arith.constant 80 : index
    %c0_18 = arith.constant 0 : index
    %37 = vector.load %arg8[%c80, %c0_18] : memref<144x256xbf16, #tpu.memory_space<vmem>>, vector<16x256xbf16>
    tpu.vector_store %arg8[%c80, %c0_18], %36 {strides = array<i32>} : memref<144x256xbf16, #tpu.memory_space<vmem>>, vector<16x256xbf16>,
    %c241_i32 = arith.constant 241 : i32
    %38 = tpu.dynamic_rotate %0 by %c241_i32 dim 1 : vector<16x256xf32>, i32 -> vector<16x256xf32>
    %c6 = arith.constant 6 : index
    %c0_19 = arith.constant 0 : index
    %c0_20 = arith.constant 0 : index
    %39 = vector.load %arg6[%c6, %c0_19, %c0_20] : memref<9x1x256xf32, #tpu.memory_space<vmem>>, vector<1x1x256xf32>
    %40 = vector.shape_cast %39 : vector<1x1x256xf32> to vector<1x256xf32>
    %41 = vector.broadcast %40 : vector<1x256xf32> to vector<16x256xf32>
    %42 = arith.mulf %38, %41 : vector<16x256xf32>
    %43 = arith.truncf %42 : vector<16x256xf32> to vector<16x256xbf16>
    %c96 = arith.constant 96 : index
    %c0_21 = arith.constant 0 : index
    %44 = vector.load %arg8[%c96, %c0_21] : memref<144x256xbf16, #tpu.memory_space<vmem>>, vector<16x256xbf16>
    tpu.vector_store %arg8[%c96, %c0_21], %43 {strides = array<i32>} : memref<144x256xbf16, #tpu.memory_space<vmem>>, vector<16x256xbf16>,
    %c240_i32 = arith.constant 240 : i32
    %45 = tpu.dynamic_rotate %0 by %c240_i32 dim 1 : vector<16x256xf32>, i32 -> vector<16x256xf32>
    %c7 = arith.constant 7 : index
    %c0_22 = arith.constant 0 : index
    %c0_23 = arith.constant 0 : index
    %46 = vector.load %arg6[%c7, %c0_22, %c0_23] : memref<9x1x256xf32, #tpu.memory_space<vmem>>, vector<1x1x256xf32>
    %47 = vector.shape_cast %46 : vector<1x1x256xf32> to vector<1x256xf32>
    %48 = vector.broadcast %47 : vector<1x256xf32> to vector<16x256xf32>
    %49 = arith.mulf %45, %48 : vector<16x256xf32>
    %50 = arith.truncf %49 : vector<16x256xf32> to vector<16x256xbf16>
    %c112 = arith.constant 112 : index
    %c0_24 = arith.constant 0 : index
    %51 = vector.load %arg8[%c112, %c0_24] : memref<144x256xbf16, #tpu.memory_space<vmem>>, vector<16x256xbf16>
    tpu.vector_store %arg8[%c112, %c0_24], %50 {strides = array<i32>} : memref<144x256xbf16, #tpu.memory_space<vmem>>, vector<16x256xbf16>,
    %c239_i32 = arith.constant 239 : i32
    %52 = tpu.dynamic_rotate %0 by %c239_i32 dim 1 : vector<16x256xf32>, i32 -> vector<16x256xf32>
    %c8 = arith.constant 8 : index
    %c0_25 = arith.constant 0 : index
    %c0_26 = arith.constant 0 : index
    %53 = vector.load %arg6[%c8, %c0_25, %c0_26] : memref<9x1x256xf32, #tpu.memory_space<vmem>>, vector<1x1x256xf32>
    %54 = vector.shape_cast %53 : vector<1x1x256xf32> to vector<1x256xf32>
    %55 = vector.broadcast %54 : vector<1x256xf32> to vector<16x256xf32>
    %56 = arith.mulf %52, %55 : vector<16x256xf32>
    %57 = arith.truncf %56 : vector<16x256xf32> to vector<16x256xbf16>
    %c128 = arith.constant 128 : index
    %c0_27 = arith.constant 0 : index
    %58 = vector.load %arg8[%c128, %c0_27] : memref<144x256xbf16, #tpu.memory_space<vmem>>, vector<16x256xbf16>
    tpu.vector_store %arg8[%c128, %c0_27], %57 {strides = array<i32>} : memref<144x256xbf16, #tpu.memory_space<vmem>>, vector<16x256xbf16>,
    %c0_28 = arith.constant 0 : index
    %c0_29 = arith.constant 0 : index
    %59 = vector.load %arg2[%c0_28, %c0_29] : memref<16x144xbf16, #tpu.memory_space<vmem>>, vector<16x144xbf16>
    %c0_30 = arith.constant 0 : index
    %c0_31 = arith.constant 0 : index
    %60 = vector.load %arg8[%c0_30, %c0_31] : memref<144x256xbf16, #tpu.memory_space<vmem>>, vector<144x256xbf16>
    %cst = arith.constant dense<0.000000e+00> : vector<16x256xf32>
    %61 = tpu.matmul %59, %60, %cst {dimension_numbers = #tpu.dot_dimension_numbers<[1], [0], [0], [1], [0, 0, 1, 1], [], []>} : vector<16x144xbf16>, vector<144x256xbf16>, vector<16x256xf32> -> vector<16x256xf32>
    %c0_32 = arith.constant 0 : index
    %c0_33 = arith.constant 0 : index
    %62 = vector.load %arg3[%c0_32, %c0_33] : memref<16x1xf32, #tpu.memory_space<vmem>>, vector<16x1xf32>
    %63 = vector.broadcast %62 : vector<16x1xf32> to vector<16x256xf32>
    %64 = arith.addf %61, %63 : vector<16x256xf32>
    %cst_34 = arith.constant 0.000000e+00 : f32
    %65 = vector.broadcast %cst_34 : f32 to vector<16x256xf32>
    %66 = arith.maximumf %64, %65 : vector<16x256xf32>
    %c17_i32_35 = arith.constant 17 : i32
    %67 = tpu.dynamic_rotate %66 by %c17_i32_35 dim 1 : vector<16x256xf32>, i32 -> vector<16x256xf32>
    %c0_36 = arith.constant 0 : index
    %c0_37 = arith.constant 0 : index
    %c0_38 = arith.constant 0 : index
    %68 = vector.load %arg6[%c0_36, %c0_37, %c0_38] : memref<9x1x256xf32, #tpu.memory_space<vmem>>, vector<1x1x256xf32>
    %69 = vector.shape_cast %68 : vector<1x1x256xf32> to vector<1x256xf32>
    %70 = vector.broadcast %69 : vector<1x256xf32> to vector<16x256xf32>
    %71 = arith.mulf %67, %70 : vector<16x256xf32>
    %72 = arith.truncf %71 : vector<16x256xf32> to vector<16x256xbf16>
    %c0_39 = arith.constant 0 : index
    %c0_40 = arith.constant 0 : index
    %73 = vector.load %arg9[%c0_39, %c0_40] : memref<144x256xbf16, #tpu.memory_space<vmem>>, vector<16x256xbf16>
    tpu.vector_store %arg9[%c0_39, %c0_40], %72 {strides = array<i32>} : memref<144x256xbf16, #tpu.memory_space<vmem>>, vector<16x256xbf16>,
    %c16_i32_41 = arith.constant 16 : i32
    %74 = tpu.dynamic_rotate %66 by %c16_i32_41 dim 1 : vector<16x256xf32>, i32 -> vector<16x256xf32>
    %c1_42 = arith.constant 1 : index
    %c0_43 = arith.constant 0 : index
    %c0_44 = arith.constant 0 : index
    %75 = vector.load %arg6[%c1_42, %c0_43, %c0_44] : memref<9x1x256xf32, #tpu.memory_space<vmem>>, vector<1x1x256xf32>
    %76 = vector.shape_cast %75 : vector<1x1x256xf32> to vector<1x256xf32>
    %77 = vector.broadcast %76 : vector<1x256xf32> to vector<16x256xf32>
    %78 = arith.mulf %74, %77 : vector<16x256xf32>
    %79 = arith.truncf %78 : vector<16x256xf32> to vector<16x256xbf16>
    %c16_45 = arith.constant 16 : index
    %c0_46 = arith.constant 0 : index
    %80 = vector.load %arg9[%c16_45, %c0_46] : memref<144x256xbf16, #tpu.memory_space<vmem>>, vector<16x256xbf16>
    tpu.vector_store %arg9[%c16_45, %c0_46], %79 {strides = array<i32>} : memref<144x256xbf16, #tpu.memory_space<vmem>>, vector<16x256xbf16>,
    %c15_i32_47 = arith.constant 15 : i32
    %81 = tpu.dynamic_rotate %66 by %c15_i32_47 dim 1 : vector<16x256xf32>, i32 -> vector<16x256xf32>
    %c2_48 = arith.constant 2 : index
    %c0_49 = arith.constant 0 : index
    %c0_50 = arith.constant 0 : index
    %82 = vector.load %arg6[%c2_48, %c0_49, %c0_50] : memref<9x1x256xf32, #tpu.memory_space<vmem>>, vector<1x1x256xf32>
    %83 = vector.shape_cast %82 : vector<1x1x256xf32> to vector<1x256xf32>
    %84 = vector.broadcast %83 : vector<1x256xf32> to vector<16x256xf32>
    %85 = arith.mulf %81, %84 : vector<16x256xf32>
    %86 = arith.truncf %85 : vector<16x256xf32> to vector<16x256xbf16>
    %c32_51 = arith.constant 32 : index
    %c0_52 = arith.constant 0 : index
    %87 = vector.load %arg9[%c32_51, %c0_52] : memref<144x256xbf16, #tpu.memory_space<vmem>>, vector<16x256xbf16>
    tpu.vector_store %arg9[%c32_51, %c0_52], %86 {strides = array<i32>} : memref<144x256xbf16, #tpu.memory_space<vmem>>, vector<16x256xbf16>,
    %c1_i32_53 = arith.constant 1 : i32
    %88 = tpu.dynamic_rotate %66 by %c1_i32_53 dim 1 : vector<16x256xf32>, i32 -> vector<16x256xf32>
    %c3_54 = arith.constant 3 : index
    %c0_55 = arith.constant 0 : index
    %c0_56 = arith.constant 0 : index
    %89 = vector.load %arg6[%c3_54, %c0_55, %c0_56] : memref<9x1x256xf32, #tpu.memory_space<vmem>>, vector<1x1x256xf32>
    %90 = vector.shape_cast %89 : vector<1x1x256xf32> to vector<1x256xf32>
    %91 = vector.broadcast %90 : vector<1x256xf32> to vector<16x256xf32>
    %92 = arith.mulf %88, %91 : vector<16x256xf32>
    %93 = arith.truncf %92 : vector<16x256xf32> to vector<16x256xbf16>
    %c48_57 = arith.constant 48 : index
    %c0_58 = arith.constant 0 : index
    %94 = vector.load %arg9[%c48_57, %c0_58] : memref<144x256xbf16, #tpu.memory_space<vmem>>, vector<16x256xbf16>
    tpu.vector_store %arg9[%c48_57, %c0_58], %93 {strides = array<i32>} : memref<144x256xbf16, #tpu.memory_space<vmem>>, vector<16x256xbf16>,
    %95 = arith.truncf %66 : vector<16x256xf32> to vector<16x256xbf16>
    %c64_59 = arith.constant 64 : index
    %c0_60 = arith.constant 0 : index
    %96 = vector.load %arg9[%c64_59, %c0_60] : memref<144x256xbf16, #tpu.memory_space<vmem>>, vector<16x256xbf16>
    tpu.vector_store %arg9[%c64_59, %c0_60], %95 {strides = array<i32>} : memref<144x256xbf16, #tpu.memory_space<vmem>>, vector<16x256xbf16>,
    %c255_i32_61 = arith.constant 255 : i32
    %97 = tpu.dynamic_rotate %66 by %c255_i32_61 dim 1 : vector<16x256xf32>, i32 -> vector<16x256xf32>
    %c5_62 = arith.constant 5 : index
    %c0_63 = arith.constant 0 : index
    %c0_64 = arith.constant 0 : index
    %98 = vector.load %arg6[%c5_62, %c0_63, %c0_64] : memref<9x1x256xf32, #tpu.memory_space<vmem>>, vector<1x1x256xf32>
    %99 = vector.shape_cast %98 : vector<1x1x256xf32> to vector<1x256xf32>
    %100 = vector.broadcast %99 : vector<1x256xf32> to vector<16x256xf32>
    %101 = arith.mulf %97, %100 : vector<16x256xf32>
    %102 = arith.truncf %101 : vector<16x256xf32> to vector<16x256xbf16>
    %c80_65 = arith.constant 80 : index
    %c0_66 = arith.constant 0 : index
    %103 = vector.load %arg9[%c80_65, %c0_66] : memref<144x256xbf16, #tpu.memory_space<vmem>>, vector<16x256xbf16>
    tpu.vector_store %arg9[%c80_65, %c0_66], %102 {strides = array<i32>} : memref<144x256xbf16, #tpu.memory_space<vmem>>, vector<16x256xbf16>,
    %c241_i32_67 = arith.constant 241 : i32
    %104 = tpu.dynamic_rotate %66 by %c241_i32_67 dim 1 : vector<16x256xf32>, i32 -> vector<16x256xf32>
    %c6_68 = arith.constant 6 : index
    %c0_69 = arith.constant 0 : index
    %c0_70 = arith.constant 0 : index
    %105 = vector.load %arg6[%c6_68, %c0_69, %c0_70] : memref<9x1x256xf32, #tpu.memory_space<vmem>>, vector<1x1x256xf32>
    %106 = vector.shape_cast %105 : vector<1x1x256xf32> to vector<1x256xf32>
    %107 = vector.broadcast %106 : vector<1x256xf32> to vector<16x256xf32>
    %108 = arith.mulf %104, %107 : vector<16x256xf32>
    %109 = arith.truncf %108 : vector<16x256xf32> to vector<16x256xbf16>
    %c96_71 = arith.constant 96 : index
    %c0_72 = arith.constant 0 : index
    %110 = vector.load %arg9[%c96_71, %c0_72] : memref<144x256xbf16, #tpu.memory_space<vmem>>, vector<16x256xbf16>
    tpu.vector_store %arg9[%c96_71, %c0_72], %109 {strides = array<i32>} : memref<144x256xbf16, #tpu.memory_space<vmem>>, vector<16x256xbf16>,
    %c240_i32_73 = arith.constant 240 : i32
    %111 = tpu.dynamic_rotate %66 by %c240_i32_73 dim 1 : vector<16x256xf32>, i32 -> vector<16x256xf32>
    %c7_74 = arith.constant 7 : index
    %c0_75 = arith.constant 0 : index
    %c0_76 = arith.constant 0 : index
    %112 = vector.load %arg6[%c7_74, %c0_75, %c0_76] : memref<9x1x256xf32, #tpu.memory_space<vmem>>, vector<1x1x256xf32>
    %113 = vector.shape_cast %112 : vector<1x1x256xf32> to vector<1x256xf32>
    %114 = vector.broadcast %113 : vector<1x256xf32> to vector<16x256xf32>
    %115 = arith.mulf %111, %114 : vector<16x256xf32>
    %116 = arith.truncf %115 : vector<16x256xf32> to vector<16x256xbf16>
    %c112_77 = arith.constant 112 : index
    %c0_78 = arith.constant 0 : index
    %117 = vector.load %arg9[%c112_77, %c0_78] : memref<144x256xbf16, #tpu.memory_space<vmem>>, vector<16x256xbf16>
    tpu.vector_store %arg9[%c112_77, %c0_78], %116 {strides = array<i32>} : memref<144x256xbf16, #tpu.memory_space<vmem>>, vector<16x256xbf16>,
    %c239_i32_79 = arith.constant 239 : i32
    %118 = tpu.dynamic_rotate %66 by %c239_i32_79 dim 1 : vector<16x256xf32>, i32 -> vector<16x256xf32>
    %c8_80 = arith.constant 8 : index
    %c0_81 = arith.constant 0 : index
    %c0_82 = arith.constant 0 : index
    %119 = vector.load %arg6[%c8_80, %c0_81, %c0_82] : memref<9x1x256xf32, #tpu.memory_space<vmem>>, vector<1x1x256xf32>
    %120 = vector.shape_cast %119 : vector<1x1x256xf32> to vector<1x256xf32>
    %121 = vector.broadcast %120 : vector<1x256xf32> to vector<16x256xf32>
    %122 = arith.mulf %118, %121 : vector<16x256xf32>
    %123 = arith.truncf %122 : vector<16x256xf32> to vector<16x256xbf16>
    %c128_83 = arith.constant 128 : index
    %c0_84 = arith.constant 0 : index
    %124 = vector.load %arg9[%c128_83, %c0_84] : memref<144x256xbf16, #tpu.memory_space<vmem>>, vector<16x256xbf16>
    tpu.vector_store %arg9[%c128_83, %c0_84], %123 {strides = array<i32>} : memref<144x256xbf16, #tpu.memory_space<vmem>>, vector<16x256xbf16>,
    %c0_85 = arith.constant 0 : index
    %c0_86 = arith.constant 0 : index
    %125 = vector.load %arg4[%c0_85, %c0_86] : memref<16x144xbf16, #tpu.memory_space<vmem>>, vector<16x144xbf16>
    %c0_87 = arith.constant 0 : index
    %c0_88 = arith.constant 0 : index
    %126 = vector.load %arg9[%c0_87, %c0_88] : memref<144x256xbf16, #tpu.memory_space<vmem>>, vector<144x256xbf16>
    %cst_89 = arith.constant dense<0.000000e+00> : vector<16x256xf32>
    %127 = tpu.matmul %125, %126, %cst_89 {dimension_numbers = #tpu.dot_dimension_numbers<[1], [0], [0], [1], [0, 0, 1, 1], [], []>} : vector<16x144xbf16>, vector<144x256xbf16>, vector<16x256xf32> -> vector<16x256xf32>
    %c0_90 = arith.constant 0 : index
    %c0_91 = arith.constant 0 : index
    %128 = vector.load %arg5[%c0_90, %c0_91] : memref<16x1xf32, #tpu.memory_space<vmem>>, vector<16x1xf32>
    %129 = vector.broadcast %128 : vector<16x1xf32> to vector<16x256xf32>
    %130 = arith.addf %127, %129 : vector<16x256xf32>
    %cst_92 = arith.constant 0.000000e+00 : f32
    %131 = vector.broadcast %cst_92 : f32 to vector<16x256xf32>
    %132 = arith.maximumf %130, %131 : vector<16x256xf32>
    %c0_93 = arith.constant 0 : index
    %c0_94 = arith.constant 0 : index
    %133 = vector.load %arg7[%c0_93, %c0_94] : memref<16x256xf32, #tpu.memory_space<vmem>>, vector<16x256xf32>
    tpu.vector_store %arg7[%c0_93, %c0_94], %132 {strides = array<i32>} : memref<16x256xf32, #tpu.memory_space<vmem>>, vector<16x256xf32>,
    return
  }
  func.func @transform_0(%arg0: i32) -> (i32, i32) {
    %c0_i32 = arith.constant 0 : i32
    %c0_i32_0 = arith.constant 0 : i32
    return %c0_i32, %arg0 : i32, i32
  }
  func.func @transform_1(%arg0: i32) -> (i32, i32) {
    %c0_i32 = arith.constant 0 : i32
    %c0_i32_0 = arith.constant 0 : i32
    %c0_i32_1 = arith.constant 0 : i32
    return %c0_i32, %c0_i32_0 : i32, i32
  }
  func.func @transform_2(%arg0: i32) -> (i32, i32) {
    %c0_i32 = arith.constant 0 : i32
    %c0_i32_0 = arith.constant 0 : i32
    %c0_i32_1 = arith.constant 0 : i32
    return %c0_i32, %c0_i32_0 : i32, i32
  }
  func.func @transform_3(%arg0: i32) -> (i32, i32) {
    %c0_i32 = arith.constant 0 : i32
    %c0_i32_0 = arith.constant 0 : i32
    %c0_i32_1 = arith.constant 0 : i32
    return %c0_i32, %c0_i32_0 : i32, i32
  }
  func.func @transform_4(%arg0: i32) -> (i32, i32) {
    %c0_i32 = arith.constant 0 : i32
    %c0_i32_0 = arith.constant 0 : i32
    %c0_i32_1 = arith.constant 0 : i32
    return %c0_i32, %c0_i32_0 : i32, i32
  }
  func.func @transform_5(%arg0: i32) -> (i32, i32, i32) {
    %c0_i32 = arith.constant 0 : i32
    %c0_i32_0 = arith.constant 0 : i32
    %c0_i32_1 = arith.constant 0 : i32
    %c0_i32_2 = arith.constant 0 : i32
    return %c0_i32, %c0_i32_0, %c0_i32_1 : i32, i32, i32
  }
  func.func @transform_6(%arg0: i32) -> (i32, i32) {
    %c0_i32 = arith.constant 0 : i32
    %c0_i32_0 = arith.constant 0 : i32
    return %c0_i32, %arg0 : i32, i32
  }
}

</mosaic_0001>

<bundles_post_ra>
// kernel: tpu_custom_call.1
= control target key start
LH: loop header
LB: loop body
LE: loop exit
PB: predicated region body
PF: predicated region fallthrough
CT: control target
= control target key end

     0   :  { %s2284_s0 = inlined_call_operand.hbm [shape: f32[16,512], index: 0, kind: input, shape index: {}]   ;;  %s2285_s1 = inlined_call_operand.vmem [shape: bf16[16,144], index: 1, kind: input, shape index: {}]   ;;  %s2286_s2 = inlined_call_operand.vmem [shape: f32[16,1], index: 2, kind: input, shape index: {}]   ;;  %s2287_s3 = inlined_call_operand.hbm [shape: bf16[16,144], index: 3, kind: input, shape index: {}]   ;;  %s2288_s4 = inlined_call_operand.vmem [shape: f32[16,1], index: 4, kind: input, shape index: {}]   ;;  %s2289_s5 = inlined_call_operand.vmem [shape: f32[9,1,256], index: 5, kind: input, shape index: {}]   ;;  %s2290_s6 = inlined_call_operand.hbm [shape: f32[16,512], index: 6, kind: output, shape index: {}]  }
   0x1   :  { %2291 = sst [smem:[#allocation13_spill]] %s2287_s3 }
   0x2   :  { %11 = vsyncpa [#allocation5], 0 }
   0x3   :  { %13 = vsyncpa [#allocation5 + $0x1], 0 }
   0x4   :  { %14 = vsyncpa [#allocation8], 0 }
   0x5   :  { %15 = vsyncpa [#allocation6], 0 }
   0x6   :  { %17 = vsyncpa [#allocation6 + $0x1], 0  ;;  %s1725_s21 = smov 0   ;;  %s1727_s22 = smov 0  }
   0x7   :  { %s1729_s23 = smov 0   ;;  %s1731_s24 = smov 0  }
   0x8 LB: > { %s1746_s25 = sadd.s32 4294967295, %s1671_s24   ;;  %s1229_s26 = sadd.s32 4294967294, %s1671_s24   ;;  %s1671_s24 = sphi %s1731_s24, %s2302_s24   ;;  %s1667_s23 = sphi %s1729_s23, %s2301_s23   ;;  %s1663_s22 = sphi %s1727_s22, %s2300_s22   ;;  %s1659_s21 = sphi %s1725_s21, %s2299_s21  }
   0x9   : > { %p43_p0 = scmp.ne.s32.totalorder %s1663_s22, %s1659_s21  ;;  %p44_p1 = scmp.eq.s32.totalorder %s1746_s25, 0 }
   0xa   : > { %p172_p2 = scmp.eq.s32.totalorder %s1746_s25, 1  ;;  %p178_p3 = scmp.eq.s32.totalorder %s1229_s26, 1 }
   0xb   : > { %p1755_p4 = por %p44_p1, %p43_p0  ;;  %p1230_p5 = scmp.ge.s32.totalorder %s1671_s24, 1 }
   0xc   : > { %p1760_p6 = por %p178_p3, %p43_p0  ;;  %p185_p7 = scmp.lt.s32.totalorder %s1671_s24, 3 }
   0xd   : > { %s2294_s3 = sld [smem:[#allocation13_spill]]  ;;  %s1673_s9 = smov [#allocation7]  }
   0xe   : > { %p1768_p8 = pnand %p1230_p5, %p185_p7  ;;  %s204_s10 = sshll.u32 %s1673_s9, 4  ;;  %s205_s10 = int_to_ptr.vmem [resolvable:$true] %s204_s10 }
   0xf   : > { %s1778_s11 = sadd.s32 1, %s1671_s24   ;;  %s1674_s12 = smov 128  }
  0x10   : > { %p1473_p9 = pneg %p1768_p8  ;;  %s1675_s13 = smov 8  }
  0x11   : > { %s27_s14 = ssub.s32 %s1671_s24, %s1778_s11  ;;  %s30_s15 = sadd.s32 1, %s1667_s23 }
  0x12   : > { %p1474_p10 = pnand %p1473_p9, %p44_p1  ;;  %p28_p12 = scmp.eq.s32.totalorder %s27_s14, 0 }
  0x13   : > { %s202_s7 = sshll.u32 %s2294_s3, 4  ;;  %p37_p13 = scmp.ne.s32.totalorder %s1667_s23, %s1663_s22  ;;  %s203_s7 = int_to_ptr.hbm [resolvable:$true] %s202_s7 }
  0x14   : > { %1476 = dma.hbm_to_vmem [thread:$0]  (!%p1474_p10), %s203_s7, 256, %s205_s10, [#allocation8], %s1674_s12, %s1674_s12, %s1675_s13  }
  0x15   : > { %p38_p0 = scmp.eq.s32.totalorder %s1671_s24, 0  ;;  %p1486_p3 = scmp.lt.s32.totalorder %s1671_s24, 2 }
  0x16   : > { %s1788_s16 = scalar_select %p28_p12, %s1667_s23, %s30_s15  }
  0x17   : > { %p39_p5 = por %p38_p0, %p37_p13  ;;  %p1792_p7 = por %p172_p2, %p37_p13 }
  0x18   : > { %s224_s18 = sand.u32 1, %s1667_s23   ;;  %s1423_s19 = sshll.u32 %s1671_s24, 4 }
  0x19   : > { %s1233_s20 = sshll.u32 %s224_s18, 5  ;;  %s233_s30 = scalar_lea.hbm %s2284_s0, %s1423_s19 }
  0x1a   : > { %s234_s7 = sshll.u32 %s233_s30, 4  ;;  %s228_s9 = scalar_lea.vmem [#allocation4], %s1233_s20  ;;  %s235_s7 = int_to_ptr.hbm [resolvable:$true] %s234_s7 }
  0x1b   : > { %s236_s10 = sshll.u32 %s228_s9, 4  ;;  %p1803_p9 = pnand %p1486_p3, %p39_p5  ;;  %s237_s10 = int_to_ptr.vmem [resolvable:$true] %s236_s10 }
  0x1c   : > { %s225_s13 = scalar_lea.sflag [#allocation5], %s224_s18  ;;  %s1571_s14 = sshra.s32 %s235_s7, 4  ;;  %s1572_s14 = int_to_ptr.hbm [resolvable:$true] %s1571_s14 }
  0x1d   : > { %s1573_s15 = scalar_lea.hbm %s1572_s14, 32  ;;  %p1575_p10 = pneg %p1803_p9 }
  0x1e   : > { %p1574_p2 = scmp.ne.s32.totalorder %s1572_s14, %s1573_s15  ;;  %s1578_s26 = scalar_lea.hbm %s2284_s0, 64 }
  0x1f   : > { %p1579_p0 = scmp.lt.s32.totalorder %s1572_s14, %s2284_s0  ;;  %p1580_p3 = scmp.lt.s32.totalorder %s1578_s26, %s1573_s15 }
  0x20   : > { %p1576_p12 = pnand %p1575_p10, %p1574_p2 }
  0x21   : > { %p1581_p5 = por %p1580_p3, %p1579_p0 }
  0x22   : > { %p1577_p13 = pneg %p1576_p12 }
  0x24   : > { %p1582_p11 = pnand %p1581_p5, %p1577_p13 }
  0x26   : > { %1585 = shalt.err (!%p1582_p11)
}
  0x27   : > { %s1676_s18 = smov 512   ;;  %s1677_s9 = smov 256  }
  0x28   : > { %s1678_s3 = smov 16   ;;  %248 = sbr.rel (%p1768_p8) target bundleno = 758 (0x2f6), region = 44 }
  0x29   : > { %1480 = dma.hbm_to_vmem [thread:$0]  (!%p1803_p9), %s235_s7, 512, %s237_s10, %s225_s13, %s1676_s18, %s1677_s9, %s1678_s3  }
  0x2a   : > { %s1820_s19 = sand.u32 (!%p1768_p8), 1, %s1663_s22  }
  0x2b   : > { %s1237_s14 = sshll.u32 (!%p1768_p8), %s1820_s19, 5  ;;  %s251_s15 = scalar_lea.sflag (!%p1768_p8), [#allocation5], %s1820_s19 }
  0x2c   : > { %s254_s20 = scalar_lea.vmem (!%p1768_p8), [#allocation4], %s1237_s14 }
  0x2d   : > { %1646 = dma.done.wait (%p1755_p4), %s251_s15, 512  }
  0x2e   : > { %1648 = vsyncadd (%p1755_p4), %s251_s15, 4294966784 }
  0x2f   : > { %1650 = dma.done.wait (%p44_p1), [#allocation8], 256  }
  0x30   : > { %1652 = vsyncadd (%p44_p1), [#allocation8], 4294967040  ;;  %v1834_v0 = vld [vmem:[%s254_s20 + $0x8] sm:$0xff]  ;;  %v1836_v1 = vld [vmem:[%s254_s20] sm:$0xff]  ;;  %s1679_s3 = smov 112   ;;  %s1680_s8 = smov 113   ;;  %v304_v5 = vlaneseq }
  0x31   : > { %473 = vrot.lane.b32.xlu1 %v1834_v0, %s1679_s3  ;;  %469 = vrot.lane.b32.xlu0 %v1836_v1, %s1679_s3  ;;  %v1844_v2 = vld [vmem:[%s254_s20 + $0x18] sm:$0xff]  ;;  %v1846_v3 = vld [vmem:[%s254_s20 + $0x10] sm:$0xff]  ;;  %s1681_s27 = smov 127   ;;  %s1682_s7 = smov 1   ;;  %v409_v23 = vpack.c.bf16 %v1834_v0, %v1836_v1  ;;  %vm656_vm8 = vcmask 130048  }
  0x32   : > { %441 = vrot.lane.b32.xlu2 %v1836_v1, %s1680_s8  ;;  %s1683_s10 = smov 15   ;;  %s1684_s12 = smov 16   ;;  %v1906_v7 = vand.u32 127, %v304_v5  ;;  %v1245_v8 = vld [vmem:[%s2289_s5 + $0xe] sm:$0x3]  ;;  %v410_v24 = vpack.c.bf16 %v1844_v2, %v1846_v3 }
  0x33   : > { %s1685_s13 = smov 17   ;;  %s1686_s26 = smov 111   ;;  %v485_v9 = vperm.slane %v1245_v8, 0  ;;  %v486_v10 = vperm.slane %v1245_v8, 1  ;;  %v1244_v27 = vld [vmem:[%s2289_s5 + $0xc] sm:$0x3] }
  0x34   : > { %vm477_vm0 = vcmp.lt.s32.totalorder %v1906_v7, 112  ;;  %411 = vst [vmem:[#allocation2 + $0x40] sm:$0xff] %v409_v23  ;;  %vm449_vm1 = vcmp.lt.s32.totalorder %v1906_v7, 113  ;;  %v457_v30 = vperm.slane %v1244_v27, 0  ;;  %v458_v31 = vperm.slane %v1244_v27, 1  ;;  %s288_s15 = scalar_lea.vmem [#allocation9], %s1237_s14 }
  0x35   : > { %412 = vst [vmem:[#allocation2 + $0x48] sm:$0xff] %v410_v24  ;;  %v1243_v42 = vld [vmem:[%s2289_s5 + $0xa] sm:$0x3]  ;;  %vm421_vm2 = vcmp.lt.s32.totalorder %v1906_v7, 127  ;;  %vm389_vm3 = vcmp.lt.s32.totalorder %v1906_v7, 1  ;;  %vm361_vm4 = vcmp.lt.s32.totalorder %v1906_v7, 15 }
  0x36   : > { %v429_v50 = vperm.slane %v1243_v42, 0  ;;  %v430_v51 = vperm.slane %v1243_v42, 1  ;;  %vm333_vm5 = vcmp.lt.s32.totalorder %v1906_v7, 16  ;;  %vm306_vm6 = vcmp.lt.s32.totalorder %v1906_v7, 17  ;;  %s1464_s20 = sshll.u32 %s1746_s25, 4  ;;  %s1143_s9 = sshll.u32 %s288_s15, 4  ;;  %s1144_s9 = int_to_ptr.vmem [resolvable:$true] %s1143_s9 }
  0x37   : > { %vm505_vm7 = vcmp.lt.s32.totalorder %v1906_v7, 111  ;;  %s1142_s18 = scalar_lea.hbm %s2290_s6, %s1464_s20  ;;  %s1131_s25 = scalar_lea.sflag [#allocation6], %s1820_s19 }
  0x38   : > { %s1145_s14 = sshll.u32 %s1142_s18, 4  ;;  %s1146_s14 = int_to_ptr.hbm [resolvable:$true] %s1145_s14 }
  0x39   : > { %475 = vrot.lane.b32.xlu1 %v1844_v2, %s1679_s3  ;;  %471 = vrot.lane.b32.xlu0 %v1846_v3, %s1679_s3 }
  0x3a   : > { %443 = vrot.lane.b32.xlu2 %v1846_v3, %s1680_s8 }
  0x41   : > { %447 = vrot.lane.b32.xlu1 %v1844_v2, %s1680_s8  ;;  %445 = vrot.lane.b32.xlu0 %v1834_v0, %s1680_s8 }
  0x42   : > { %413 = vrot.lane.b32.xlu2 %v1836_v1, %s1681_s27 }
  0x49   : > { %417 = vrot.lane.b32.xlu1 %v1834_v0, %s1681_s27  ;;  %415 = vrot.lane.b32.xlu0 %v1846_v3, %s1681_s27 }
  0x4a   : > { %419 = vrot.lane.b32.xlu2 %v1844_v2, %s1681_s27 }
  0x51   : > { %383 = vrot.lane.b32.xlu1 %v1846_v3, %s1682_s7  ;;  %381 = vrot.lane.b32.xlu0 %v1836_v1, %s1682_s7 }
  0x52   : > { %385 = vrot.lane.b32.xlu2 %v1834_v0, %s1682_s7 }
  0x59   : > { %353 = vrot.lane.b32.xlu1 %v1836_v1, %s1683_s10  ;;  %387 = vrot.lane.b32.xlu0 %v1844_v2, %s1682_s7 }
  0x5a   : > { %355 = vrot.lane.b32.xlu2 %v1846_v3, %s1683_s10 }
  0x61   : > { %359 = vrot.lane.b32.xlu1 %v1844_v2, %s1683_s10  ;;  %357 = vrot.lane.b32.xlu0 %v1834_v0, %s1683_s10 }
  0x62   : > { %325 = vrot.lane.b32.xlu2 %v1836_v1, %s1684_s12 }
  0x69   : > { %329 = vrot.lane.b32.xlu1 %v1834_v0, %s1684_s12  ;;  %327 = vrot.lane.b32.xlu0 %v1846_v3, %s1684_s12 }
  0x6a   : > { %331 = vrot.lane.b32.xlu2 %v1844_v2, %s1684_s12 }
  0x71   : > { %298 = vrot.lane.b32.xlu1 %v1846_v3, %s1685_s13  ;;  %296 = vrot.lane.b32.xlu0 %v1836_v1, %s1685_s13 }
  0x72   : > { %300 = vrot.lane.b32.xlu2 %v1834_v0, %s1685_s13 }
  0x79   : > { %497 = vrot.lane.b32.xlu1 %v1836_v1, %s1686_s26  ;;  %302 = vrot.lane.b32.xlu0 %v1844_v2, %s1685_s13 }
  0x7a   : > { %499 = vrot.lane.b32.xlu2 %v1846_v3, %s1686_s26 }
  0x81   : > { %503 = vrot.lane.b32.xlu1 %v1844_v2, %s1686_s26  ;;  %501 = vrot.lane.b32.xlu0 %v1834_v0, %s1686_s26  ;;  %v1242_v0 = vld [vmem:[%s2289_s5 + $0x6] sm:$0x3] }
  0x82   : > { %v397_v5 = vperm.slane %v1242_v0, 0 }
  0x8c   : > { %v442_v4 = vpop.permute.xlu2 %441 }
  0x94   : > { %v444_v6 = vpop.permute.xlu2 %443 }
  0x9c   : > { %v414_v15 = vpop.permute.xlu2 %413 }
  0xa3   : > { %v474_v11 = vpop.permute.xlu1 %473  ;;  %v470_v12 = vpop.permute.xlu0 %469 }
  0xa4   : > { %v478_v13 = vsel %vm477_vm0, %v470_v12, %v474_v11  ;;  %v480_v14 = vsel %vm477_vm0, %v474_v11, %v470_v12  ;;  %v420_v28 = vpop.permute.xlu2 %419 }
  0xa5   : > { %v489_v16 = vmul.f32 %v485_v9, %v478_v13  ;;  %v490_v17 = vmul.f32 %v486_v10, %v480_v14 }
  0xa7   : > { %v493_v18 = vpack.c.bf16 %v490_v17, %v489_v16 }
  0xa9   : > { %495 = vst [vmem:[#allocation2 + $0x70] sm:$0xff] %v493_v18 }
  0xab   : > { %v476_v19 = vpop.permute.xlu1 %475  ;;  %v472_v20 = vpop.permute.xlu0 %471 }
  0xac   : > { %v479_v21 = vsel %vm477_vm0, %v472_v20, %v476_v19  ;;  %v481_v22 = vsel %vm477_vm0, %v476_v19, %v472_v20  ;;  %v386_v49 = vpop.permute.xlu2 %385  ;;  %v1289_v20 = vld [vmem:[#allocation2 + $0x40] sm:$0xf] }
  0xad   : > { %v491_v25 = vmul.f32 %v485_v9, %v479_v21  ;;  %v492_v26 = vmul.f32 %v486_v10, %v481_v22  ;;  %v398_v9 = vperm.slane %v1242_v0, 1  ;;  %v1435_v21 = vld [vmem:[#allocation2 + $0x44] sm:$0xf0]  ;;  %v1434_v22 = vld [vmem:[#allocation2 + $0x44] sm:$0xf] }
  0xaf   : > { %v494_v29 = vpack.c.bf16 %v492_v26, %v491_v25  ;;  %v1291_v25 = vld [vmem:[#allocation2 + $0x48] sm:$0xf0] }
  0xb0   : > { %v1313_v45 = vld [vmem:[#allocation2 + $0x70] sm:$0xf]  ;;  %v1440_v47 = vld [vmem:[#allocation2 + $0x74] sm:$0xf] }
  0xb1   : > { %496 = vst [vmem:[#allocation2 + $0x78] sm:$0xff] %v494_v29 }
  0xb3   : > { %v448_v32 = vpop.permute.xlu1 %447  ;;  %v446_v33 = vpop.permute.xlu0 %445 }
  0xb4   : > { %v451_v34 = vsel %vm449_vm1, %v444_v6, %v448_v32  ;;  %v453_v35 = vsel %vm449_vm1, %v448_v32, %v444_v6  ;;  %v450_v36 = vsel %vm449_vm1, %v442_v4, %v446_v33  ;;  %v452_v37 = vsel %vm449_vm1, %v446_v33, %v442_v4  ;;  %v356_v12 = vpop.permute.xlu2 %355 }
  0xb5   : > { %v463_v38 = vmul.f32 %v457_v30, %v451_v34  ;;  %v464_v39 = vmul.f32 %v458_v31, %v453_v35  ;;  %v461_v40 = vmul.f32 %v457_v30, %v450_v36  ;;  %v462_v41 = vmul.f32 %v458_v31, %v452_v37 }
  0xb6   : > { %v1290_v32 = vor.u32 %v1435_v21, %v1289_v20  ;;  %v1294_v35 = vor.u32 %v1434_v22, %v1291_v25 }
  0xb7   : > { %v466_v43 = vpack.c.bf16 %v464_v39, %v463_v38  ;;  %v465_v44 = vpack.c.bf16 %v462_v41, %v461_v40  ;;  %v1241_v39 = vld [vmem:[%s2289_s5 + $0x4] sm:$0x3] }
  0xb8   : > { %v1441_v46 = vld [vmem:[#allocation2 + $0x74] sm:$0xf0]  ;;  %v1315_v48 = vld [vmem:[#allocation2 + $0x78] sm:$0xf0]  ;;  %v369_v41 = vperm.slane %v1241_v39, 0  ;;  %v370_v42 = vperm.slane %v1241_v39, 1 }
  0xb9   : > { %468 = vst [vmem:[#allocation2 + $0x68] sm:$0xff] %v466_v43  ;;  %v1314_v52 = vor.u32 %v1441_v46, %v1313_v45  ;;  %v1318_v53 = vor.u32 %v1440_v47, %v1315_v48 }
  0xba   : > { %467 = vst [vmem:[#allocation2 + $0x60] sm:$0xff] %v465_v44 }
  0xbb   : > { %v418_v54 = vpop.permute.xlu1 %417  ;;  %660 = vmatpush.bf16.msra.mxu0 %v1314_v52  ;;  %688 = vmatpush.bf16.msra.mxu2 %v1318_v53  ;;  %v416_v55 = vpop.permute.xlu0 %415  ;;  %v1240_v53 = vld [vmem:[%s2289_s5 + $0x2] sm:$0x3] }
  0xbc   : > { %v422_v56 = vsel %vm421_vm2, %v414_v15, %v418_v54  ;;  %v424_v57 = vsel %vm421_vm2, %v418_v54, %v414_v15  ;;  %v423_v58 = vsel %vm421_vm2, %v416_v55, %v420_v28  ;;  %v425_v59 = vsel %vm421_vm2, %v420_v28, %v416_v55  ;;  %v326_v38 = vpop.permute.xlu2 %325 }
  0xbd   : > { %v433_v60 = vmul.f32 %v429_v50, %v422_v56  ;;  %v434_v61 = vmul.f32 %v430_v51, %v424_v57  ;;  %v435_v62 = vmul.f32 %v429_v50, %v423_v58  ;;  %v436_v63 = vmul.f32 %v430_v51, %v425_v59 }
  0xbf   : > { %v437_v1 = vpack.c.bf16 %v434_v61, %v433_v60  ;;  %v438_v2 = vpack.c.bf16 %v436_v63, %v435_v62  ;;  %v341_v61 = vperm.slane %v1240_v53, 0  ;;  %v342_v62 = vperm.slane %v1240_v53, 1 }
  0xc0   : > { %v1439_v3 = vld [vmem:[#allocation2 + $0x64] sm:$0xf0]  ;;  %v1307_v4 = vld [vmem:[#allocation2 + $0x68] sm:$0xf0] }
  0xc1   : > { %439 = vst [vmem:[#allocation2 + $0x50] sm:$0xff] %v437_v1  ;;  %v1305_v6 = vld [vmem:[#allocation2 + $0x60] sm:$0xf]  ;;  %v1438_v8 = vld [vmem:[#allocation2 + $0x64] sm:$0xf] }
  0xc2   : > { %440 = vst [vmem:[#allocation2 + $0x58] sm:$0xff] %v438_v2  ;;  %v1306_v10 = vor.u32 %v1439_v3, %v1305_v6  ;;  %v1310_v11 = vor.u32 %v1438_v8, %v1307_v4 }
  0xc3   : > { %v384_v13 = vpop.permute.xlu1 %383  ;;  %v382_v14 = vpop.permute.xlu0 %381 }
  0xc4   : > { %661 = vmatpush.bf16.msra.mxu0 %v1306_v10  ;;  %689 = vmatpush.bf16.msra.mxu2 %v1310_v11  ;;  %v390_v15 = vsel %vm389_vm3, %v382_v14, %v386_v49  ;;  %v392_v16 = vsel %vm389_vm3, %v386_v49, %v382_v14  ;;  %v332_v56 = vpop.permute.xlu2 %331 }
  0xc5   : > { %v401_v17 = vmul.f32 %v397_v5, %v392_v16  ;;  %v402_v18 = vmul.f32 %v398_v9, %v390_v15 }
  0xc7   : > { %v405_v19 = vpack.c.bf16 %v402_v18, %v401_v17 }
  0xc8   : > { %v1297_v23 = vld [vmem:[#allocation2 + $0x50] sm:$0xf]  ;;  %v1436_v24 = vld [vmem:[#allocation2 + $0x54] sm:$0xf] }
  0xc9   : > { %407 = vst [vmem:[#allocation2 + $0x30] sm:$0xff] %v405_v19  ;;  %v1437_v26 = vld [vmem:[#allocation2 + $0x54] sm:$0xf0]  ;;  %v1299_v27 = vld [vmem:[#allocation2 + $0x58] sm:$0xf0] }
  0xca   : > { %v1298_v28 = vor.u32 %v1437_v26, %v1297_v23  ;;  %v1302_v29 = vor.u32 %v1436_v24, %v1299_v27 }
  0xcb   : > { %v354_v30 = vpop.permute.xlu1 %353  ;;  %v388_v31 = vpop.permute.xlu0 %387 }
  0xcc   : > { %662 = vmatpush.bf16.msra.mxu0 %v1298_v28  ;;  %690 = vmatpush.bf16.msra.mxu2 %v1302_v29  ;;  %v391_v33 = vsel %vm389_vm3, %v384_v13, %v388_v31  ;;  %v393_v34 = vsel %vm389_vm3, %v388_v31, %v384_v13  ;;  %v301_v18 = vpop.permute.xlu2 %300 }
  0xcd   : > { %v403_v36 = vmul.f32 %v397_v5, %v393_v34  ;;  %v404_v37 = vmul.f32 %v398_v9, %v391_v33 }
  0xcf   : > { %v406_v40 = vpack.c.bf16 %v404_v37, %v403_v36 }
  0xd0   : > { %663 = vmatpush.bf16.msra.mxu0 %v1290_v32  ;;  %691 = vmatpush.bf16.msra.mxu2 %v1294_v35  ;;  %v1281_v57 = vld [vmem:[#allocation2 + $0x30] sm:$0xf]  ;;  %v1432_v59 = vld [vmem:[#allocation2 + $0x34] sm:$0xf] }
  0xd1   : > { %408 = vst [vmem:[#allocation2 + $0x38] sm:$0xff] %v406_v40 }
  0xd3   : > { %v360_v43 = vpop.permute.xlu1 %359  ;;  %v358_v44 = vpop.permute.xlu0 %357 }
  0xd4   : > { %v363_v45 = vsel %vm361_vm4, %v356_v12, %v360_v43  ;;  %v365_v46 = vsel %vm361_vm4, %v360_v43, %v356_v12  ;;  %v362_v47 = vsel %vm361_vm4, %v354_v30, %v358_v44  ;;  %v364_v48 = vsel %vm361_vm4, %v358_v44, %v354_v30  ;;  %v311_v12 = vld [vmem:[%s2289_s5] sm:$0x3]  ;;  %v1246_v43 = vld [vmem:[%s2289_s5 + $0x10] sm:$0x3]  ;;  %v546_v44 = vld [vmem:[%s2286_s2 + $0x8] sm:$0xff] }
  0xd5   : > { %v375_v49 = vmul.f32 %v369_v41, %v365_v46  ;;  %v376_v50 = vmul.f32 %v370_v42, %v363_v45  ;;  %v373_v51 = vmul.f32 %v369_v41, %v364_v48  ;;  %v374_v52 = vmul.f32 %v370_v42, %v362_v47  ;;  %v545_v45 = vld [vmem:[%s2286_s2] sm:$0xff] }
  0xd6   : > { %v313_v15 = vperm.slane %v311_v12, 0  ;;  %v314_v19 = vperm.slane %v311_v12, 1  ;;  %v1687_v47 = vmov 0   ;;  %v513_v48 = vperm.slane %v1246_v43, 0  ;;  %v1251_v12 = vld [vmem:[%s2285_s1 + $0x8] sm:$0xf0] }
  0xd7   : > { %v378_v54 = vpack.c.bf16 %v376_v50, %v375_v49  ;;  %v377_v55 = vpack.c.bf16 %v374_v52, %v373_v51  ;;  %1539 = vset.pattern.permute.xlu0 %v1687_v47  ;;  %1538 = vset.pattern.permute.xlu2 %v1687_v47  ;;  %v514_v49 = vperm.slane %v1246_v43, 1  ;;  %v500_v50 = vpop.permute.xlu2 %499 }
  0xd8   : > { %v1433_v58 = vld [vmem:[#allocation2 + $0x34] sm:$0xf0]  ;;  %v1283_v60 = vld [vmem:[#allocation2 + $0x38] sm:$0xf0]  ;;  %554 = vperm.xlu0 %1539, %v546_v44   ;;  %549 = vperm.xlu2 %1538, %v545_v45  }
  0xd9   : > { %380 = vst [vmem:[#allocation2 + $0x28] sm:$0xff] %v378_v54  ;;  %v1282_v63 = vor.u32 %v1433_v58, %v1281_v57  ;;  %v1286_v0 = vor.u32 %v1432_v59, %v1283_v60  ;;  %1540 = vset.pattern.permute.xlu1 %v1687_v47 }
  0xda   : > { %379 = vst [vmem:[#allocation2 + $0x20] sm:$0xff] %v377_v55 }
  0xdb   : > { %v330_v1 = vpop.permute.xlu1 %329  ;;  %v328_v2 = vpop.permute.xlu0 %327  ;;  %664 = vmatpush.bf16.msra.mxu0 %v1282_v63  ;;  %692 = vmatpush.bf16.msra.mxu2 %v1286_v0  ;;  %v1249_v0 = vld [vmem:[%s2285_s1] sm:$0xf] }
  0xdc   : > { %v334_v3 = vsel %vm333_vm5, %v326_v38, %v330_v1  ;;  %v336_v4 = vsel %vm333_vm5, %v330_v1, %v326_v38  ;;  %v335_v5 = vsel %vm333_vm5, %v328_v2, %v332_v56  ;;  %v337_v6 = vsel %vm333_vm5, %v332_v56, %v328_v2  ;;  %v1425_v1 = vld [vmem:[%s2285_s1 + $0x4] sm:$0xf0] }
  0xdd   : > { %v345_v8 = vmul.f32 %v341_v61, %v336_v4  ;;  %v346_v9 = vmul.f32 %v342_v62, %v334_v3  ;;  %v347_v10 = vmul.f32 %v341_v61, %v337_v6  ;;  %v348_v11 = vmul.f32 %v342_v62, %v335_v5 }
  0xdf   : > { %v349_v13 = vpack.c.bf16 %v346_v9, %v345_v8  ;;  %v350_v14 = vpack.c.bf16 %v348_v11, %v347_v10  ;;  %v1250_v8 = vor.u32 %v1425_v1, %v1249_v0  ;;  %v1424_v9 = vld [vmem:[%s2285_s1 + $0x4] sm:$0xf] }
  0xe0   : > { %v1431_v16 = vld [vmem:[#allocation2 + $0x24] sm:$0xf0]  ;;  %v1275_v17 = vld [vmem:[#allocation2 + $0x28] sm:$0xf0] }
  0xe1   : > { %351 = vst [vmem:[#allocation2 + $0x10] sm:$0xff] %v349_v13  ;;  %v1273_v20 = vld [vmem:[#allocation2 + $0x20] sm:$0xf]  ;;  %v1430_v21 = vld [vmem:[#allocation2 + $0x24] sm:$0xf] }
  0xe2   : > { %352 = vst [vmem:[#allocation2 + $0x18] sm:$0xff] %v350_v14  ;;  %v1274_v22 = vor.u32 %v1431_v16, %v1273_v20  ;;  %v1278_v23 = vor.u32 %v1430_v21, %v1275_v17  ;;  %v1254_v17 = vor.u32 %v1424_v9, %v1251_v12 }
  0xe3   : > { %v299_v24 = vpop.permute.xlu1 %298  ;;  %v297_v25 = vpop.permute.xlu0 %296 }
  0xe4   : > { %v307_v26 = vsel %vm306_vm6, %v297_v25, %v301_v18  ;;  %v309_v27 = vsel %vm306_vm6, %v301_v18, %v297_v25  ;;  %665 = vmatpush.bf16.msra.mxu0 %v1274_v22  ;;  %693 = vmatpush.bf16.msra.mxu2 %v1278_v23 }
  0xe5   : > { %v317_v28 = vmul.f32 %v313_v15, %v309_v27  ;;  %v318_v29 = vmul.f32 %v314_v19, %v307_v26 }
  0xe7   : > { %v321_v30 = vpack.c.bf16 %v318_v29, %v317_v28 }
  0xe8   : > { %v1265_v31 = vld [vmem:[#allocation2 + $0x10] sm:$0xf]  ;;  %v1428_v32 = vld [vmem:[#allocation2 + $0x14] sm:$0xf] }
  0xe9   : > { %323 = vst [vmem:[#allocation2] sm:$0xff] %v321_v30  ;;  %v1429_v33 = vld [vmem:[#allocation2 + $0x14] sm:$0xf0]  ;;  %v1267_v34 = vld [vmem:[#allocation2 + $0x18] sm:$0xf0] }
  0xea   : > { %v1266_v35 = vor.u32 %v1429_v33, %v1265_v31  ;;  %v1270_v36 = vor.u32 %v1428_v32, %v1267_v34 }
  0xeb   : > { %v498_v37 = vpop.permute.xlu1 %497  ;;  %v303_v38 = vpop.permute.xlu0 %302 }
  0xec   : > { %v308_v39 = vsel %vm306_vm6, %v299_v24, %v303_v38  ;;  %v310_v40 = vsel %vm306_vm6, %v303_v38, %v299_v24  ;;  %666 = vmatpush.bf16.msra.mxu0 %v1266_v35  ;;  %694 = vmatpush.bf16.msra.mxu2 %v1270_v36 }
  0xed   : > { %v319_v41 = vmul.f32 %v313_v15, %v310_v40  ;;  %v320_v42 = vmul.f32 %v314_v19, %v308_v39 }
  0xef   : > { %v322_v46 = vpack.c.bf16 %v320_v42, %v319_v41  ;;  %v953_v42 = vld [vmem:[%s2288_s4 + $0x8] sm:$0xff] }
  0xf0   : > { %v1257_v63 = vld [vmem:[#allocation2] sm:$0xf]  ;;  %v1426_v3 = vld [vmem:[#allocation2 + $0x4] sm:$0xf] }
  0xf1   : > { %324 = vst [vmem:[#allocation2 + $0x8] sm:$0xff] %v322_v46 }
  0xf3   : > { %v504_v51 = vpop.permute.xlu1 %503  ;;  %v502_v52 = vpop.permute.xlu0 %501 }
  0xf4   : > { %v507_v53 = vsel %vm505_vm7, %v500_v50, %v504_v51  ;;  %v509_v54 = vsel %vm505_vm7, %v504_v51, %v500_v50  ;;  %v506_v55 = vsel %vm505_vm7, %v498_v37, %v502_v52  ;;  %v508_v56 = vsel %vm505_vm7, %v502_v52, %v498_v37 }
  0xf5   : > { %v519_v57 = vmul.f32 %v513_v48, %v507_v53  ;;  %v520_v58 = vmul.f32 %v514_v49, %v509_v54  ;;  %v517_v59 = vmul.f32 %v513_v48, %v506_v55  ;;  %v518_v60 = vmul.f32 %v514_v49, %v508_v56  ;;  %v2074_v49 = vld [vmem:[%s2289_s5 + $0xc] sm:$0x3] }
  0xf6   : > { %v868_v50 = vperm.slane %v2074_v49, 0  ;;  %v869_v51 = vperm.slane %v2074_v49, 1 }
  0xf7   : > { %v522_v61 = vpack.c.bf16 %v520_v58, %v519_v57  ;;  %v521_v62 = vpack.c.bf16 %v518_v60, %v517_v59  ;;  %v2089_v59 = vld [vmem:[%s2289_s5 + $0x6] sm:$0x3] }
  0xf8   : > { %v1427_v2 = vld [vmem:[#allocation2 + $0x4] sm:$0xf0]  ;;  %v1259_v4 = vld [vmem:[#allocation2 + $0x8] sm:$0xf0] }
  0xf9   : > { %524 = vst [vmem:[#allocation2 + $0x88] sm:$0xff] %v522_v61  ;;  %v1258_v5 = vor.u32 %v1427_v2, %v1257_v63  ;;  %v1262_v6 = vor.u32 %v1426_v3, %v1259_v4  ;;  %v812_v61 = vperm.slane %v2089_v59, 0 }
  0xfa   : > { %523 = vst [vmem:[#allocation2 + $0x80] sm:$0xff] %v521_v62  ;;  %v813_v62 = vperm.slane %v2089_v59, 1  ;;  %v1444_v59 = vld [vmem:[#allocation7 + $0x4] sm:$0xf] }
  0xfb   : > { %667 = vmatpush.bf16.msra.mxu0 %v1258_v5  ;;  %695 = vmatpush.bf16.msra.mxu2 %v1262_v6  ;;  %v2104_v6 = vld [vmem:[%s2289_s5 + $0xa] sm:$0x3] }
  0xfe   : > { %668 = vmatmul.bf16.vlgmr.msra.gmra.mxu0 %v1250_v8  ;;  %696 = vmatmul.bf16.vlgmr.msra.gmra.mxu2 %v1250_v8  ;;  %v1334_v8 = vld [vmem:[%s2289_s5 + $0xe] sm:$0x3] }
  0xff   : > { %v894_v12 = vperm.slane %v1334_v8, 0 }
 0x100   : > { %v1443_v10 = vld [vmem:[#allocation2 + $0x84] sm:$0xf0]  ;;  %v1323_v11 = vld [vmem:[#allocation2 + $0x88] sm:$0xf0] }
 0x101   : > { %v1321_v13 = vld [vmem:[#allocation2 + $0x80] sm:$0xf]  ;;  %v1442_v14 = vld [vmem:[#allocation2 + $0x84] sm:$0xf] }
 0x102   : > { %v1322_v15 = vor.u32 %v1443_v10, %v1321_v13  ;;  %v1326_v16 = vor.u32 %v1442_v14, %v1323_v11  ;;  %v842_v10 = vperm.slane %v2104_v6, 0  ;;  %v843_v11 = vperm.slane %v2104_v6, 1 }
 0x103   : > { %v895_v13 = vperm.slane %v1334_v8, 1 }
 0x104   : > { %681 = vmatpush.bf16.msra.mxu1 %v1322_v15  ;;  %709 = vmatpush.bf16.msrb.mxu2 %v1326_v16 }
 0x107   : > { %1327 = vmatmul.msk.bf16.vlgmr.msra.gmra.mxu1 %vm656_vm8, %v1254_v17 }
 0x10e   : > { %1328 = vmatmul.msk.bf16.vlgmr.msrb.gmra.mxu2 %vm656_vm8, %v1254_v17 }
 0x132   : > { %v550_v19 = vpop.permute.xlu2 %549 }
 0x14a   : > { %v555_v25 = vpop.permute.xlu0 %554 }
 0x17b   : > { %v669_v18 = vpop.f32.mrf.mxu0 }
 0x17c   : > { %v670_v20 = vadd.f32 %v669_v18, %v550_v19 }
 0x181   : > { %v697_v21 = vpop.f32.mrf.mxu2 }
 0x182   : > { %v698_v32 = vadd.f32 %v697_v21, %v550_v19 }
 0x183   : > { %v671_v26 = vpop.f32.mrf.mxu0 }
 0x184   : > { %v683_v22 = vpop.f32.mrf.mxu1  ;;  %v672_v28 = vadd.f32 %v671_v26, %v555_v25 }
 0x185   : > { %v684_v23 = vadd.f32 %v683_v22, %v670_v20 }
 0x187   : > { %v716_v24 = vmax.f32 %v684_v23, 0.0 }
 0x189   : > { %906 = vrot.lane.b32.xlu2 %v716_v24, %s1686_s26  ;;  %854 = vrot.lane.b32.xlu0 %v716_v24, %s1680_s8  ;;  %v699_v27 = vpop.f32.mrf.mxu2 }
 0x18a   : > { %880 = vrot.lane.b32.xlu1 %v716_v24, %s1679_s3  ;;  %v700_v37 = vadd.f32 %v699_v27, %v555_v25  ;;  %v2126_v25 = vld [vmem:[%s2289_s5 + $0x4] sm:$0x3] }
 0x18c   : > { %v685_v29 = vpop.f32.mrf.mxu1 }
 0x18d   : > { %v686_v30 = vadd.f32 %v685_v29, %v672_v28  ;;  %v786_v28 = vperm.slane %v2126_v25, 0  ;;  %v787_v29 = vperm.slane %v2126_v25, 1 }
 0x18f   : > { %v718_v31 = vmax.f32 %v686_v30, 0.0 }
 0x191   : > { %882 = vrot.lane.b32.xlu2 %v718_v31, %s1679_s3  ;;  %798 = vrot.lane.b32.xlu0 %v716_v24, %s1682_s7  ;;  %v711_v33 = vpop.f32.mrf.mxu2 }
 0x192   : > { %828 = vrot.lane.b32.xlu1 %v716_v24, %s1681_s27  ;;  %v712_v34 = vadd.f32 %v711_v33, %v698_v32 }
 0x194   : > { %v717_v35 = vmax.f32 %v712_v34, 0.0 }
 0x196   : > { %v824_v36 = vpack.c.bf16 %v717_v35, %v716_v24 }
 0x198   : > { %826 = vst [vmem:[#allocation3 + $0x40] sm:$0xff] %v824_v36 }
 0x199   : > { %830 = vrot.lane.b32.xlu2 %v718_v31, %s1681_s27  ;;  %908 = vrot.lane.b32.xlu0 %v718_v31, %s1686_s26  ;;  %v713_v38 = vpop.f32.mrf.mxu2 }
 0x19a   : > { %772 = vrot.lane.b32.xlu1 %v716_v24, %s1683_s10  ;;  %v714_v39 = vadd.f32 %v713_v38, %v700_v37  ;;  %v1335_v37 = vld [vmem:[%s2289_s5 + $0x10] sm:$0x3] }
 0x19c   : > { %v719_v40 = vmax.f32 %v714_v39, 0.0  ;;  %v920_v39 = vperm.slane %v1335_v37, 0 }
 0x19e   : > { %v825_v41 = vpack.c.bf16 %v719_v40, %v718_v31 }
 0x1a0   : > { %827 = vst [vmem:[#allocation3 + $0x48] sm:$0xff] %v825_v41 }
 0x1a1   : > { %774 = vrot.lane.b32.xlu2 %v718_v31, %s1683_s10  ;;  %832 = vrot.lane.b32.xlu0 %v717_v35, %s1681_s27 }
 0x1a2   : > { %856 = vrot.lane.b32.xlu1 %v718_v31, %s1680_s8 }
 0x1a9   : > { %776 = vrot.lane.b32.xlu0 %v717_v35, %s1683_s10  ;;  %858 = vrot.lane.b32.xlu2 %v717_v35, %s1680_s8 }
 0x1aa   : > { %800 = vrot.lane.b32.xlu1 %v718_v31, %s1682_s7 }
 0x1b1   : > { %748 = vrot.lane.b32.xlu0 %v718_v31, %s1684_s12  ;;  %802 = vrot.lane.b32.xlu2 %v717_v35, %s1682_s7 }
 0x1b2   : > { %884 = vrot.lane.b32.xlu1 %v717_v35, %s1679_s3 }
 0x1b9   : > { %860 = vrot.lane.b32.xlu0 %v719_v40, %s1680_s8  ;;  %886 = vrot.lane.b32.xlu2 %v719_v40, %s1679_s3  ;;  %s1615_s3 = sshra.s32 %s1146_s14, 4  ;;  %s1616_s3 = int_to_ptr.hbm [resolvable:$true] %s1615_s3 }
 0x1ba   : > { %910 = vrot.lane.b32.xlu1 %v717_v35, %s1686_s26  ;;  %s1617_s8 = scalar_lea.hbm %s1616_s3, 32  ;;  %p1622_p11 = scmp.lt.s32.totalorder %s1616_s3, %s2290_s6 }
 0x1bb   : > { %p1618_p1 = scmp.ne.s32.totalorder %s1616_s3, %s1617_s8 }
 0x1bd   : > { %p1619_p4 = pnand %p1618_p1, %p1792_p7 }
 0x1bf   : > { %p1620_p8 = pneg %p1619_p4 }
 0x1c1   : > { %804 = vrot.lane.b32.xlu0 %v719_v40, %s1682_s7  ;;  %746 = vrot.lane.b32.xlu2 %v716_v24, %s1684_s12 }
 0x1c2   : > { %834 = vrot.lane.b32.xlu1 %v719_v40, %s1681_s27 }
 0x1c9   : > { %720 = vrot.lane.b32.xlu0 %v716_v24, %s1685_s13  ;;  %912 = vrot.lane.b32.xlu2 %v719_v40, %s1686_s26 }
 0x1ca   : > { %750 = vrot.lane.b32.xlu1 %v717_v35, %s1684_s12 }
 0x1d1   : > { %726 = vrot.lane.b32.xlu0 %v719_v40, %s1685_s13  ;;  %752 = vrot.lane.b32.xlu2 %v719_v40, %s1684_s12 }
 0x1d2   : > { %778 = vrot.lane.b32.xlu1 %v719_v40, %s1683_s10  ;;  %v921_v40 = vperm.slane %v1335_v37, 1  ;;  %s1621_s10 = scalar_lea.hbm %s2290_s6, 64 }
 0x1d3   : > { %p1623_p9 = scmp.lt.s32.totalorder %s1621_s10, %s1617_s8 }
 0x1d5   : > { %p1624_p2 = por %p1623_p9, %p1622_p11 }
 0x1d7   : > { %p1625_p10 = pnand %p1624_p2, %p1620_p8 }
 0x1d9   : > { %724 = vrot.lane.b32.xlu2 %v717_v35, %s1685_s13 }
 0x1da   : > { %722 = vrot.lane.b32.xlu1 %v718_v31, %s1685_s13 }
 0x1e1   : > { %961 = vperm.xlu2 %1538, %v953_v42  }
 0x1e3   : > { %v2063_v43 = vpop.permute.xlu2 %906 }
 0x1eb   : > { %v883_v44 = vpop.permute.xlu2 %882 }
 0x1f3   : > { %v2065_v45 = vpop.permute.xlu2 %830 }
 0x1fb   : > { %v2067_v46 = vpop.permute.xlu2 %774  ;;  %v855_v47 = vpop.permute.xlu0 %854 }
 0x1fc   : > { %v2069_v48 = vpop.permute.xlu1 %880 }
 0x203   : > { %v799_v52 = vpop.permute.xlu0 %798  ;;  %v859_v53 = vpop.permute.xlu2 %858 }
 0x204   : > { %v829_v54 = vpop.permute.xlu1 %828  ;;  %v862_v55 = vsel %vm449_vm1, %v855_v47, %v859_v53  ;;  %v864_v56 = vsel %vm449_vm1, %v859_v53, %v855_v47 }
 0x205   : > { %v872_v57 = vmul.f32 %v868_v50, %v862_v55  ;;  %v873_v58 = vmul.f32 %v869_v51, %v864_v56 }
 0x207   : > { %v876_v60 = vpack.c.bf16 %v873_v58, %v872_v57 }
 0x209   : > { %878 = vst [vmem:[#allocation3 + $0x60] sm:$0xff] %v876_v60  ;;  %v2156_v60 = vld [vmem:[%s2289_s5 + $0x2] sm:$0x3] }
 0x20b   : > { %v909_v63 = vpop.permute.xlu0 %908  ;;  %v803_v0 = vpop.permute.xlu2 %802 }
 0x20c   : > { %v773_v1 = vpop.permute.xlu1 %772  ;;  %v806_v2 = vsel %vm389_vm3, %v799_v52, %v803_v0  ;;  %v808_v3 = vsel %vm389_vm3, %v803_v0, %v799_v52 }
 0x20d   : > { %v816_v4 = vmul.f32 %v812_v61, %v808_v3  ;;  %v817_v5 = vmul.f32 %v813_v62, %v806_v2  ;;  %v761_v2 = vperm.slane %v2156_v60, 1 }
 0x20f   : > { %v820_v9 = vpack.c.bf16 %v817_v5, %v816_v4 }
 0x211   : > { %822 = vst [vmem:[#allocation3 + $0x30] sm:$0xff] %v820_v9 }
 0x213   : > { %v833_v14 = vpop.permute.xlu0 %832  ;;  %v887_v15 = vpop.permute.xlu2 %886 }
 0x214   : > { %v857_v16 = vpop.permute.xlu1 %856  ;;  %v836_v17 = vsel %vm421_vm2, %v829_v54, %v833_v14  ;;  %v838_v18 = vsel %vm421_vm2, %v833_v14, %v829_v54  ;;  %v889_v19 = vsel %vm477_vm0, %v883_v44, %v887_v15  ;;  %v891_v20 = vsel %vm477_vm0, %v887_v15, %v883_v44 }
 0x215   : > { %v846_v21 = vmul.f32 %v842_v10, %v836_v17  ;;  %v847_v22 = vmul.f32 %v843_v11, %v838_v18  ;;  %v900_v23 = vmul.f32 %v894_v12, %v889_v19  ;;  %v901_v24 = vmul.f32 %v895_v13, %v891_v20 }
 0x217   : > { %v850_v26 = vpack.c.bf16 %v847_v22, %v846_v21  ;;  %v903_v27 = vpack.c.bf16 %v901_v24, %v900_v23 }
 0x219   : > { %852 = vst [vmem:[#allocation3 + $0x50] sm:$0xff] %v850_v26 }
 0x21a   : > { %905 = vst [vmem:[#allocation3 + $0x78] sm:$0xff] %v903_v27 }
 0x21b   : > { %v777_v30 = vpop.permute.xlu0 %776  ;;  %v2130_v31 = vpop.permute.xlu2 %746 }
 0x21c   : > { %v801_v32 = vpop.permute.xlu1 %800  ;;  %v780_v33 = vsel %vm361_vm4, %v773_v1, %v777_v30  ;;  %v782_v34 = vsel %vm361_vm4, %v777_v30, %v773_v1  ;;  %v760_v1 = vperm.slane %v2156_v60, 0  ;;  %v2189_v30 = vld [vmem:[%s2289_s5] sm:$0x3] }
 0x21d   : > { %v790_v35 = vmul.f32 %v786_v28, %v782_v34  ;;  %v791_v36 = vmul.f32 %v787_v29, %v780_v33 }
 0x21f   : > { %v794_v38 = vpack.c.bf16 %v791_v36, %v790_v35 }
 0x221   : > { %796 = vst [vmem:[#allocation3 + $0x20] sm:$0xff] %v794_v38  ;;  %v1461_v22 = vld [vmem:[#allocation3 + $0x74] sm:$0xf0] }
 0x223   : > { %v749_v41 = vpop.permute.xlu0 %748  ;;  %v913_v42 = vpop.permute.xlu2 %912 }
 0x224   : > { %v915_v44 = vsel %vm505_vm7, %v909_v63, %v913_v42  ;;  %v917_v47 = vsel %vm505_vm7, %v913_v42, %v909_v63  ;;  %v885_v52 = vpop.permute.xlu1 %884  ;;  %v1340_v42 = vld [vmem:[#allocation7 + $0x8] sm:$0xf0] }
 0x225   : > { %v926_v53 = vmul.f32 %v920_v39, %v915_v44  ;;  %v927_v54 = vmul.f32 %v921_v40, %v917_v47  ;;  %v888_v55 = vsel %vm477_vm0, %v2069_v48, %v885_v52  ;;  %v890_v56 = vsel %vm477_vm0, %v885_v52, %v2069_v48 }
 0x226   : > { %v898_v57 = vmul.f32 %v894_v12, %v888_v55  ;;  %v899_v58 = vmul.f32 %v895_v13, %v890_v56  ;;  %v735_v44 = vperm.slane %v2189_v30, 1  ;;  %v1404_v56 = vld [vmem:[#allocation3 + $0x78] sm:$0xf0] }
 0x227   : > { %v929_v0 = vpack.c.bf16 %v927_v54, %v926_v53 }
 0x228   : > { %v902_v63 = vpack.c.bf16 %v899_v58, %v898_v57 }
 0x229   : > { %931 = vst [vmem:[#allocation3 + $0x88] sm:$0xff] %v929_v0 }
 0x22a   : > { %904 = vst [vmem:[#allocation3 + $0x70] sm:$0xff] %v902_v63 }
 0x22b   : > { %v861_v3 = vpop.permute.xlu0 %860  ;;  %v753_v4 = vpop.permute.xlu2 %752 }
 0x22c   : > { %v863_v48 = vsel %vm449_vm1, %v857_v16, %v861_v3  ;;  %v865_v5 = vsel %vm449_vm1, %v861_v3, %v857_v16  ;;  %v755_v8 = vsel %vm333_vm5, %v749_v41, %v753_v4  ;;  %v757_v9 = vsel %vm333_vm5, %v753_v4, %v749_v41  ;;  %v911_v12 = vpop.permute.xlu1 %910 }
 0x22d   : > { %v874_v13 = vmul.f32 %v868_v50, %v863_v48  ;;  %v875_v14 = vmul.f32 %v869_v51, %v865_v5  ;;  %v766_v15 = vmul.f32 %v760_v1, %v757_v9  ;;  %v767_v17 = vmul.f32 %v761_v2, %v755_v8 }
 0x22e   : > { %v914_v16 = vsel %vm505_vm7, %v2063_v43, %v911_v12  ;;  %v916_v18 = vsel %vm505_vm7, %v911_v12, %v2063_v43  ;;  %v1343_v3 = vor.u32 %v1444_v59, %v1340_v42 }
 0x22f   : > { %v877_v19 = vpack.c.bf16 %v875_v14, %v874_v13  ;;  %v769_v20 = vpack.c.bf16 %v767_v17, %v766_v15  ;;  %v924_v50 = vmul.f32 %v920_v39, %v914_v16  ;;  %v925_v21 = vmul.f32 %v921_v40, %v916_v18  ;;  %v1394_v39 = vld [vmem:[#allocation3 + $0x60] sm:$0xf]  ;;  %v1458_v15 = vld [vmem:[#allocation3 + $0x64] sm:$0xf]  ;;  %v952_v17 = vld [vmem:[%s2288_s4] sm:$0xff] }
 0x230   : > { %v1463_v41 = vld [vmem:[#allocation3 + $0x84] sm:$0xf0]  ;;  %v1386_v18 = vld [vmem:[#allocation3 + $0x50] sm:$0xf]  ;;  %956 = vperm.xlu1 %1540, %v952_v17  }
 0x231   : > { %879 = vst [vmem:[#allocation3 + $0x68] sm:$0xff] %v877_v19  ;;  %v928_v49 = vpack.c.bf16 %v925_v21, %v924_v50  ;;  %v1402_v51 = vld [vmem:[#allocation3 + $0x70] sm:$0xf]  ;;  %v1460_v52 = vld [vmem:[#allocation3 + $0x74] sm:$0xf] }
 0x232   : > { %771 = vst [vmem:[#allocation3 + $0x18] sm:$0xff] %v769_v20  ;;  %v1403_v23 = vor.u32 %v1461_v22, %v1402_v51  ;;  %v1407_v63 = vor.u32 %v1460_v52, %v1404_v56  ;;  %v1456_v19 = vld [vmem:[#allocation3 + $0x54] sm:$0xf]  ;;  %v1455_v50 = vld [vmem:[#allocation3 + $0x44] sm:$0xf0] }
 0x233   : > { %930 = vst [vmem:[#allocation3 + $0x80] sm:$0xff] %v928_v49  ;;  %v805_v24 = vpop.permute.xlu0 %804  ;;  %v725_v6 = vpop.permute.xlu2 %724  ;;  %v1378_v22 = vld [vmem:[#allocation3 + $0x40] sm:$0xf] }
 0x234   : > { %v807_v26 = vsel %vm389_vm3, %v801_v32, %v805_v24  ;;  %v809_v27 = vsel %vm389_vm3, %v805_v24, %v801_v32  ;;  %1066 = vmatpush.bf16.msrb.mxu1 %v1403_v23  ;;  %v835_v43 = vpop.permute.xlu1 %834  ;;  %v1380_v23 = vld [vmem:[#allocation3 + $0x48] sm:$0xf0] }
 0x235   : > { %v818_v33 = vmul.f32 %v812_v61, %v809_v27  ;;  %v819_v34 = vmul.f32 %v813_v62, %v807_v26  ;;  %v837_v35 = vsel %vm421_vm2, %v2065_v45, %v835_v43  ;;  %v839_v32 = vsel %vm421_vm2, %v835_v43, %v2065_v45  ;;  %v1412_v45 = vld [vmem:[#allocation3 + $0x88] sm:$0xf0]  ;;  %v1454_v43 = vld [vmem:[#allocation3 + $0x44] sm:$0xf] }
 0x236   : > { %v848_v36 = vmul.f32 %v842_v10, %v837_v35  ;;  %v849_v37 = vmul.f32 %v843_v11, %v839_v32  ;;  %v734_v61 = vperm.slane %v2189_v30, 0  ;;  %v1379_v27 = vor.u32 %v1455_v50, %v1378_v22  ;;  %v1370_v32 = vld [vmem:[#allocation3 + $0x30] sm:$0xf] }
 0x237   : > { %v821_v38 = vpack.c.bf16 %v819_v34, %v818_v33  ;;  %v1383_v35 = vor.u32 %v1454_v43, %v1380_v23 }
 0x238   : > { %v851_v62 = vpack.c.bf16 %v849_v37, %v848_v36  ;;  %v1459_v40 = vld [vmem:[#allocation3 + $0x64] sm:$0xf0]  ;;  %v1396_v8 = vld [vmem:[#allocation3 + $0x68] sm:$0xf0]  ;;  %v1452_v37 = vld [vmem:[#allocation3 + $0x34] sm:$0xf] }
 0x239   : > { %823 = vst [vmem:[#allocation3 + $0x38] sm:$0xff] %v821_v38  ;;  %v1395_v47 = vor.u32 %v1459_v40, %v1394_v39  ;;  %v1399_v16 = vor.u32 %v1458_v15, %v1396_v8  ;;  %v1449_v7 = vld [vmem:[#allocation3 + $0x14] sm:$0xf0] }
 0x23a   : > { %853 = vst [vmem:[#allocation3 + $0x58] sm:$0xff] %v851_v62  ;;  %v1410_v10 = vld [vmem:[#allocation3 + $0x80] sm:$0xf]  ;;  %v1462_v53 = vld [vmem:[#allocation3 + $0x84] sm:$0xf] }
 0x23b   : > { %v721_v11 = vpop.permute.xlu0 %720  ;;  %1067 = vmatpush.bf16.msrb.mxu1 %v1395_v47  ;;  %v1411_v54 = vor.u32 %v1463_v41, %v1410_v10  ;;  %v1415_v55 = vor.u32 %v1462_v53, %v1412_v45  ;;  %v1362_v41 = vld [vmem:[#allocation3 + $0x20] sm:$0xf]  ;;  %v1450_v47 = vld [vmem:[#allocation3 + $0x24] sm:$0xf] }
 0x23c   : > { %v728_v57 = vsel %vm306_vm6, %v721_v11, %v725_v6  ;;  %v730_v58 = vsel %vm306_vm6, %v725_v6, %v721_v11  ;;  %v751_v0 = vpop.permute.xlu1 %750  ;;  %v1356_v11 = vld [vmem:[#allocation3 + $0x18] sm:$0xf0] }
 0x23d   : > { %v738_v4 = vmul.f32 %v734_v61, %v730_v58  ;;  %v739_v48 = vmul.f32 %v735_v44, %v728_v57  ;;  %1087 = vmatpush.bf16.msra.mxu3 %v1411_v54  ;;  %1115 = vmatpush.bf16.msrb.mxu0 %v1415_v55  ;;  %v754_v5 = vsel %vm333_vm5, %v2130_v31, %v751_v0  ;;  %v1445_v55 = vld [vmem:[#allocation7 + $0x4] sm:$0xf0] }
 0x23e   : > { %v756_v9 = vsel %vm333_vm5, %v751_v0, %v2130_v31  ;;  %v765_v12 = vmul.f32 %v761_v2, %v754_v5 }
 0x23f   : > { %v742_v13 = vpack.c.bf16 %v739_v48, %v738_v4  ;;  %v764_v14 = vmul.f32 %v760_v1, %v756_v9 }
 0x240   : > { %1416 = vmatmul.msk.bf16.vlgmr.msra.gmra.mxu3 %vm656_vm8, %v1343_v3  ;;  %1417 = vmatmul.msk.bf16.vlgmr.msrb.gmra.mxu0 %vm656_vm8, %v1343_v3  ;;  %v1453_v33 = vld [vmem:[#allocation3 + $0x34] sm:$0xf0]  ;;  %v1372_v36 = vld [vmem:[#allocation3 + $0x38] sm:$0xf0] }
 0x241   : > { %1094 = vmatpush.bf16.msrb.mxu3 %v1407_v63  ;;  %744 = vst [vmem:[#allocation3] sm:$0xff] %v742_v13  ;;  %v768_v31 = vpack.c.bf16 %v765_v12, %v764_v14  ;;  %v1457_v2 = vld [vmem:[#allocation3 + $0x54] sm:$0xf0]  ;;  %v1388_v20 = vld [vmem:[#allocation3 + $0x58] sm:$0xf0] }
 0x242   : > { %v1387_v60 = vor.u32 %v1457_v2, %v1386_v18  ;;  %v1391_v1 = vor.u32 %v1456_v19, %v1388_v20 }
 0x243   : > { %770 = vst [vmem:[#allocation3 + $0x10] sm:$0xff] %v768_v31  ;;  %v727_v38 = vpop.permute.xlu0 %726 }
 0x244   : > { %1068 = vmatpush.bf16.msrb.mxu1 %v1387_v60  ;;  %v779_v21 = vpop.permute.xlu1 %778 }
 0x245   : > { %1095 = vmatpush.bf16.msrb.mxu3 %v1399_v16  ;;  %v781_v49 = vsel %vm361_vm4, %v2067_v46, %v779_v21  ;;  %v783_v51 = vsel %vm361_vm4, %v779_v21, %v2067_v46  ;;  %v1371_v46 = vor.u32 %v1453_v33, %v1370_v32  ;;  %v962_v16 = vpop.permute.xlu2 %961 }
 0x246   : > { %v792_v24 = vmul.f32 %v786_v28, %v783_v51  ;;  %v793_v26 = vmul.f32 %v787_v29, %v781_v49  ;;  %v1375_v28 = vor.u32 %v1452_v37, %v1372_v36 }
 0x248   : > { %v795_v34 = vpack.c.bf16 %v793_v26, %v792_v24  ;;  %1069 = vmatpush.bf16.msrb.mxu1 %v1379_v27  ;;  %v1346_v30 = vld [vmem:[#allocation3] sm:$0xf]  ;;  %v1446_v57 = vld [vmem:[#allocation3 + $0x4] sm:$0xf] }
 0x249   : > { %1096 = vmatpush.bf16.msrb.mxu3 %v1391_v1 }
 0x24a   : > { %797 = vst [vmem:[#allocation3 + $0x28] sm:$0xff] %v795_v34  ;;  %v1354_v53 = vld [vmem:[#allocation3 + $0x10] sm:$0xf]  ;;  %v1448_v6 = vld [vmem:[#allocation3 + $0x14] sm:$0xf] }
 0x24b   : > { %v1355_v54 = vor.u32 %v1449_v7, %v1354_v53 }
 0x24c   : > { %v723_v39 = vpop.permute.xlu1 %722  ;;  %1070 = vmatpush.bf16.msrb.mxu1 %v1371_v46 }
 0x24d   : > { %1097 = vmatpush.bf16.msrb.mxu3 %v1383_v35  ;;  %v729_v25 = vsel %vm306_vm6, %v723_v39, %v727_v38  ;;  %v731_v29 = vsel %vm306_vm6, %v727_v38, %v723_v39 }
 0x24e   : > { %v740_v59 = vmul.f32 %v734_v61, %v731_v29  ;;  %v741_v62 = vmul.f32 %v735_v44, %v729_v25  ;;  %v1359_v61 = vor.u32 %v1448_v6, %v1356_v11  ;;  %v1338_v44 = vld [vmem:[#allocation7] sm:$0xf] }
 0x24f   : > { %v1339_v3 = vor.u32 %v1445_v55, %v1338_v44 }
 0x250   : > { %v743_v40 = vpack.c.bf16 %v741_v62, %v740_v59 }
 0x251   : > { %1098 = vmatpush.bf16.msrb.mxu3 %v1375_v28  ;;  %v1451_v42 = vld [vmem:[#allocation3 + $0x24] sm:$0xf0]  ;;  %v1364_v45 = vld [vmem:[#allocation3 + $0x28] sm:$0xf0] }
 0x252   : > { %745 = vst [vmem:[#allocation3 + $0x8] sm:$0xff] %v743_v40  ;;  %v1363_v52 = vor.u32 %v1451_v42, %v1362_v41  ;;  %v1367_v10 = vor.u32 %v1450_v47, %v1364_v45 }
 0x254   : > { %1071 = vmatpush.bf16.msrb.mxu1 %v1363_v52 }
 0x255   : > { %1099 = vmatpush.bf16.msrb.mxu3 %v1367_v10 }
 0x258   : > { %1072 = vmatpush.bf16.msrb.mxu1 %v1355_v54 }
 0x259   : > { %1100 = vmatpush.bf16.msrb.mxu3 %v1359_v61  ;;  %v1447_v56 = vld [vmem:[#allocation3 + $0x4] sm:$0xf0]  ;;  %v1348_v58 = vld [vmem:[#allocation3 + $0x8] sm:$0xf0] }
 0x25a   : > { %v1347_v0 = vor.u32 %v1447_v56, %v1346_v30  ;;  %v1351_v63 = vor.u32 %v1446_v57, %v1348_v58 }
 0x25c   : > { %1073 = vmatpush.bf16.msrb.mxu1 %v1347_v0 }
 0x25d   : > { %1101 = vmatpush.bf16.msrb.mxu3 %v1351_v63 }
 0x25f   : > { %1074 = vmatmul.bf16.vlgmr.msrb.gmra.mxu1 %v1339_v3 }
 0x260   : > { %1102 = vmatmul.bf16.vlgmr.msrb.gmra.mxu3 %v1339_v3 }
 0x2a2   : > { %v957_v5 = vpop.permute.xlu1 %956 }
 0x2bd   : > { %v1117_v14 = vpop.f32.mrf.mxu0 }
 0x2c3   : > { %v1089_v4 = vpop.f32.mrf.mxu3 }
 0x2c5   : > { %v1119_v21 = vpop.f32.mrf.mxu0 }
 0x2cb   : > { %v1091_v48 = vpop.f32.mrf.mxu3 }
 0x2dc   : > { %v1075_v8 = vpop.f32.mrf.mxu1 }
 0x2dd   : > { %v1076_v9 = vadd.f32 %v1075_v8, %v957_v5 }
 0x2df   : > { %v1090_v12 = vadd.f32 %v1089_v4, %v1076_v9 }
 0x2e1   : > { %v1122_v13 = vmax.f32 %v1090_v12, 0.0 }
 0x2e3   : > { %v1103_v15 = vpop.f32.mrf.mxu3  ;;  %1126 = vst [vmem:[%s288_s15] sm:$0xff] %v1122_v13 }
 0x2e4   : > { %v1104_v17 = vadd.f32 %v1103_v15, %v957_v5  ;;  %v1077_v18 = vpop.f32.mrf.mxu1 }
 0x2e5   : > { %v1078_v31 = vadd.f32 %v1077_v18, %v962_v16 }
 0x2e6   : > { %v1118_v19 = vadd.f32 %v1117_v14, %v1104_v17 }
 0x2e7   : > { %v1092_v20 = vadd.f32 %v1091_v48, %v1078_v31 }
 0x2e8   : > { %v1123_v2 = vmax.f32 %v1118_v19, 0.0 }
 0x2e9   : > { %v1124_v60 = vmax.f32 %v1092_v20, 0.0 }
 0x2ea   : > { %1127 = vst [vmem:[%s288_s15 + $0x8] sm:$0xff] %v1123_v2 }
 0x2eb   : > { %v1105_v1 = vpop.f32.mrf.mxu3  ;;  %1128 = vst [vmem:[%s288_s15 + $0x10] sm:$0xff] %v1124_v60 }
 0x2ec   : > { %v1106_v50 = vadd.f32 %v1105_v1, %v962_v16 }
 0x2ee   : > { %v1120_v49 = vadd.f32 %v1119_v21, %v1106_v50 }
 0x2f0   : > { %v1125_v51 = vmax.f32 %v1120_v49, 0.0 }
 0x2f2   : > { %1129 = vst [vmem:[%s288_s15 + $0x18] sm:$0xff] %v1125_v51 }
 0x2f3   : > { %1628 = shalt.err (!%p1625_p10)
}
 0x2f4   : > { %s1688_s19 = smov 256   ;;  %s1689_s15 = smov 512  }
 0x2f5   : > { %1471 = dma.vmem_to_hbm [thread:$0]  (%p1792_p7), %s1144_s9, 512, %s1146_s14, %s1131_s25, %s1688_s19, %s1689_s15, %s1684_s12  }
 0x2f6 PF: > { %s1160_s20 = sand.u32 1, %s1659_s21   ;;  %p2298_p12 = scmp.ge.s32.totalorder %s1671_s24, 2 }
 0x2f7   : > { %s1161_s29 = scalar_lea.sflag [#allocation6], %s1160_s20 }
 0x2f8   : > { %p1482_p13 = pnand %p2298_p12, %p1760_p6 }
 0x2fa   : > { %p1483_p0 = pneg %p1482_p13 }
 0x2fc   : > { %1654 = dma.done.wait (%p1483_p0), %s1161_s29, 512  }
 0x2fd   : > { %1656 = vsyncadd (%p1483_p0), %s1161_s29, 4294966784  ;;  %p20_p3 = scmp.ge.s32.totalorder %s1778_s11, 4   ;;  %s2299_s21 = smov %s1663_s22 }
 0x2fe   : > { %s2300_s22 = smov %s1667_s23  ;;  %s2301_s23 = smov %s1788_s16 }
 0x2ff   : > { %s2302_s24 = smov %s1778_s11  ;;  %22 = sbr.rel (!%p20_p3) target bundleno = 8 (0x8), region = 100 }
 0x304   :  { %1167 = vsyncpa [#allocation5], 1 }
 0x305   :  { %1169 = vsyncpa [#allocation5 + $0x1], 1 }
 0x306   :  { %1170 = vsyncpa [#allocation8], 1 }
 0x307   :  { %1171 = vsyncpa [#allocation6], 1 }
 0x308   :  { %1173 = vsyncpa [#allocation6 + $0x1], 1 }

</bundles_post_ra>
